<compile_context>
chip_gen: v7x
topology: tpu7x:2x2x1
jax: 0.10.0
libtpu: 0.0.40
codegen_flags: <defaults>
</compile_context>

<pallas_src>
import functools
import math

import jax
import jax.numpy as jnp
import numpy as np
from jax.experimental import pallas as pl
from jax.experimental.pallas import tpu as pltpu


def _cdiv(a, b):
    return -(-a // b)


def _round_up(x, m):
    return _cdiv(x, m) * m


def _attention_kernel(x_ref, wqkv_ref, bqkv_ref, wo_ref, bo_ref,
                      mask_ref, asum_ref, abcast_ref, o_ref, *,
                      seq_len, dim, num_head, head_size):
    """One tile of windows per grid step.  x block is (tile*L, D) bf16."""
    L, D, H, hd = seq_len, dim, num_head, head_size
    HL = H * L
    T = x_ref.shape[0] // L                               # windows in this tile (static)

    # Fused QKV projection: one (T*L, D) x (D, 3D) bf16 MXU matmul, f32 accumulate.
    # (1/sqrt(hd) is pre-folded into the Q columns of wqkv / bqkv by the wrapper.)
    qkv = jnp.dot(x_ref[...], wqkv_ref[...],
                  preferred_element_type=jnp.float32) + bqkv_ref[...]
    q = qkv[:, 0 * D:1 * D].astype(jnp.bfloat16).reshape(T, L, D)
    k = qkv[:, 1 * D:2 * D].astype(jnp.bfloat16).reshape(T, L, D)
    v = qkv[:, 2 * D:3 * D].astype(jnp.bfloat16).reshape(T, L, D)

    mask = mask_ref[...]                                  # (HL, D) 0/1 block-diag head mask

    # Block-diagonal key expansion: kb[w, h*L+m, c] = k[w, m, c] iff c//hd == h.
    # All heads' scores then come from ONE lane-dense batched matmul
    # (contraction K = D, output N = H*L lanes) instead of H tiny K=hd matmuls.
    kb = jnp.concatenate([k] * H, axis=1) * mask          # (T, HL, D) bf16
    s = jnp.einsum('blc,bsc->bls', q, kb,
                   preferred_element_type=jnp.float32)    # (T, L, HL) f32
    s = s.reshape(T * L, HL)

    # Softmax per 16-lane head segment, done lane-dense on the (., HL) layout.
    # Subtracting the row-global max (over all heads) is a valid shift for every segment.
    e = jnp.exp(s - jnp.max(s, axis=-1, keepdims=True))   # (T*L, HL) f32

    # Per-head denominators via a tiny constant matmul; approximate reciprocal -> EUP.
    denom = jnp.dot(e, asum_ref[...], preferred_element_type=jnp.float32)      # (T*L, H)
    rec = pl.reciprocal(denom, approx=True)
    rec_b = jnp.dot(rec, abcast_ref[...], preferred_element_type=jnp.float32)  # (T*L, D)

    # Block-diagonal value expansion (kb is dead here, so its VMEM gets reused).
    vb = jnp.concatenate([v] * H, axis=1) * mask          # (T, HL, D) bf16
    ctx = jnp.einsum('bls,bsc->blc',
                     e.reshape(T, L, HL).astype(jnp.bfloat16), vb,
                     preferred_element_type=jnp.float32)  # (T, L, D) f32
    ctx = ctx.reshape(T * L, D) * rec_b                   # per-head normalization

    out = jnp.dot(ctx.astype(jnp.bfloat16), wo_ref[...],
                  preferred_element_type=jnp.float32) + bo_ref[...]
    o_ref[...] = out.astype(o_ref.dtype)


def _vmem_capacity_bytes():
    try:
        info = pltpu.get_tpu_info()
        cap = getattr(info, "vmem_capacity_bytes", 0)
        if cap:
            return int(cap)
    except Exception:
        pass
    return 64 * 1024 * 1024                               # conservative (v7x per-core VMEM)


def _per_window_vmem_bytes(L, D, H):
    """Conservative VMEM bytes per window of tile (128-lane padding + double buffers)."""
    pad = lambda n: _round_up(n, 128)
    pD, p3D, pHL = pad(D), pad(3 * D), pad(H * L)
    b = (2 * L * pD * 2          # x input block, bf16, double-buffered
         + 2 * L * pD * 4        # output block, f32, double-buffered
         + L * p3D * 4           # fused qkv, f32
         + 3 * L * pD * 2        # q, k, v, bf16
         + (H * L) * pD * 2      # kb / vb (not live simultaneously), bf16
         + 2 * L * pHL * 4       # scores + exp, f32
         + 2 * L * pD * 4)       # ctx + broadcast reciprocal, f32
    return int(b * 1.5)          # headroom for compiler temporaries / relayouts


def _choose_tiling(BW, max_tile, row_mult):
    """Pick (n_steps, windows-per-step).  Aims for >= 4 grid steps (keeps both v7x
    TensorCores busy, pipeline depth) while capping padding waste at ~12.5% and keeping
    tiles as large as the VMEM budget allows."""
    max_tile = max(row_mult, (max_tile // row_mult) * row_mult)
    min_steps = _cdiv(BW, max_tile)
    n_steps = max(min_steps, min(4, BW))
    tile = _round_up(_cdiv(BW, n_steps), row_mult)
    n_steps = _cdiv(BW, tile)
    while n_steps > min_steps and (n_steps * tile - BW) * 8 > BW:
        n_steps -= 1
        tile = _round_up(_cdiv(BW, n_steps), row_mult)
        n_steps = _cdiv(BW, tile)
    return n_steps, tile


def attention_forward(x, params, num_head, *, max_windows_per_step=512):
    """x: (b, nWh, nWw, L, D) float32.
    params: (wq, bq, wk, bk, wv, bv, wo, bo); weights in (in, out) layout (== PyTorch
    weight.T), biases (1, D)."""
    b, nwh, nww, L, D = x.shape
    assert D % num_head == 0
    H = num_head
    hd = D // H
    HL = H * L
    BW = b * nwh * nww

    wq, bq, wk, bk, wv, bv, wo, bo = params
    scale = 1.0 / math.sqrt(hd)
    # Fused QKV weight with the attention scale folded into the Q columns (free on host).
    wqkv = jnp.concatenate([wq * scale, wk, wv], axis=1).astype(jnp.bfloat16)   # (D, 3D)
    bqkv = jnp.concatenate([bq * scale, bk, bv], axis=1).astype(jnp.float32)    # (1, 3D)
    wo_b = wo.astype(jnp.bfloat16)
    bo_f = bo.astype(jnp.float32)

    # Constant structure matrices, built once on host.
    srow = np.arange(HL)
    mask_kv = (srow[:, None] // L == np.arange(D)[None, :] // hd)               # (HL, D)
    a_sum = (srow[:, None] // L == np.arange(H)[None, :])                       # (HL, H)
    a_bcast = (np.arange(H)[:, None] == np.arange(D)[None, :] // hd)            # (H, D)
    mask_kv = jnp.asarray(mask_kv.astype(np.float32), jnp.bfloat16)
    a_sum = jnp.asarray(a_sum.astype(np.float32))
    a_bcast = jnp.asarray(a_bcast.astype(np.float32))

    # Generation-aware tile choice: fit the working set in ~45% of this chip's VMEM
    # (v7x: 64 MiB, v5e/v6e: 128 MiB) and keep >= 4 grid steps when possible.
    vmem_cap = _vmem_capacity_bytes()
    vmem_tile_cap = max(8, int(vmem_cap * 0.45) // _per_window_vmem_bytes(L, D, H))
    row_mult = 16 // math.gcd(L, 16)      # bf16 sublane packing for the (tile*L, D) block
    max_tile = max(row_mult, min(max_windows_per_step, vmem_tile_cap))
    n_steps, tile = _choose_tiling(BW, max_tile, row_mult)
    BW_pad = n_steps * tile

    xf = x.reshape(BW * L, D)                             # contiguous slab (free reshape)
    if BW_pad != BW:
        xf = jnp.pad(xf, ((0, (BW_pad - BW) * L), (0, 0)))
    xf = xf.astype(jnp.bfloat16)                          # halves HBM slab, native MXU rate

    flops_per_win = (2 * L * D * 3 * D                    # fused QKV projection
                     + 2 * L * D * HL                     # all-head scores
                     + 2 * L * HL * H                     # per-head softmax denominators
                     + 2 * L * H * D                      # denominator broadcast
                     + 2 * L * HL * D                     # context
                     + 2 * L * D * D)                     # output projection
    cost = pl.CostEstimate(
        flops=BW_pad * flops_per_win,
        transcendentals=BW_pad * (L * HL + L * H),
        bytes_accessed=(2 * BW_pad * L * D                # x in (bf16)
                        + 4 * BW_pad * L * D              # out (f32)
                        + 2 * (3 * D * D + D * D)         # weights (bf16)
                        + 4 * 4 * D + 2 * HL * D + 4 * HL * H + 4 * H * D))

    kernel = functools.partial(_attention_kernel, seq_len=L, dim=D,
                               num_head=H, head_size=hd)

    out = pl.pallas_call(
        kernel,
        out_shape=jax.ShapeDtypeStruct((BW_pad * L, D), x.dtype),
        grid_spec=pltpu.PrefetchScalarGridSpec(
            num_scalar_prefetch=0,
            grid=(n_steps,),
            in_specs=[
                pl.BlockSpec((tile * L, D), lambda i: (i, 0)),   # token slab (bf16)
                pl.BlockSpec((D, 3 * D), lambda i: (0, 0)),      # fused Wqkv (resident)
                pl.BlockSpec((1, 3 * D), lambda i: (0, 0)),      # fused bias
                pl.BlockSpec((D, D), lambda i: (0, 0)),          # Wo
                pl.BlockSpec((1, D), lambda i: (0, 0)),          # bo
                pl.BlockSpec((HL, D), lambda i: (0, 0)),         # block-diag head mask
                pl.BlockSpec((HL, H), lambda i: (0, 0)),         # segment-sum matrix
                pl.BlockSpec((H, D), lambda i: (0, 0)),          # segment-broadcast matrix
            ],
            out_specs=pl.BlockSpec((tile * L, D), lambda i: (i, 0)),
        ),
        compiler_params=pltpu.CompilerParams(
            dimension_semantics=("parallel",),                   # shards steps across TCs
            vmem_limit_bytes=int(vmem_cap * 0.9)),
        cost_estimate=cost,
    )(xf, wqkv, bqkv, wo_b, bo_f, mask_kv, a_sum, a_bcast)

    return out[:BW * L].reshape(b, nwh, nww, L, D)


def attention_reference(x, params, num_head):
    """Pure-JAX f32 reference mirroring the PyTorch non-axial forward."""
    wq, bq, wk, bk, wv, bv, wo, bo = params
    b, nwh, nww, L, D = x.shape
    hd = D // num_head

    q = x @ wq + bq[0]
    k = x @ wk + bk[0]
    v = x @ wv + bv[0]

    def split(t):
        t = t.reshape(b, nwh, nww, L, num_head, hd)
        return jnp.transpose(t, (0, 1, 2, 4, 3, 5))              # (b,nWh,nWw,H,L,hd)

    qh, kh, vh = split(q), split(k), split(v)
    s = jnp.einsum('...ld,...md->...lm', qh, kh) / math.sqrt(hd)
    p = jax.nn.softmax(s, axis=-1)
    ctx = jnp.einsum('...lm,...md->...ld', p, vh)
    ctx = jnp.transpose(ctx, (0, 1, 2, 4, 3, 5)).reshape(b, nwh, nww, L, D)
    return ctx @ wo + bo[0]


def init_params(key, dim):
    """Deterministic init. PyTorch nn.Linear has weight (out, in); forward is
    x @ W.T + b, so we store the transposed (in, out) weight directly."""
    keys = jax.random.split(key, 8)
    bound = 1.0 / math.sqrt(dim)

    def lin(kw, kb):
        w_pt = jax.random.uniform(kw, (dim, dim), jnp.float32, -bound, bound)  # (out, in)
        bvec = jax.random.uniform(kb, (1, dim), jnp.float32, -bound, bound)
        return w_pt.T, bvec                                                     # (in, out)

    wq, bq = lin(keys[0], keys[1])
    wk, bk = lin(keys[2], keys[3])
    wv, bv = lin(keys[4], keys[5])
    wo, bo = lin(keys[6], keys[7])
    return wq, bq, wk, bk, wv, bv, wo, bo


if __name__ == "__main__":
    # Small shapes consistent with the module: win_size=4 -> L=16 tokens/window,
    # head=8 heads, dim=32 -> head_size=4.  30 windows exercises tiling + padding
    # (4 grid steps of 8 windows, 2 padded).
    B, NWH, NWW, L, DIM = 2, 3, 5, 16, 32
    NUM_HEAD = 8

    key = jax.random.PRNGKey(0)
    kx, kp = jax.random.split(key)
    x = jax.random.normal(kx, (B, NWH, NWW, L, DIM), jnp.float32)
    params = init_params(kp, DIM)

    out = attention_forward(x, params, NUM_HEAD)
    out = jax.block_until_ready(out)

    ref = attention_reference(x, params, NUM_HEAD)
    # Tolerance covers bf16 MXU inputs (projections + score/context matmuls) and the
    # EUP approximate reciprocal; measured deviation is ~5e-3 rms, ~2e-2 worst element.
    np.testing.assert_allclose(np.asarray(out), np.asarray(ref), atol=3e-2, rtol=3e-2)

    print("KERNEL_OK")
</pallas_src>

<mosaic_0001>
module attributes {stable_mosaic.version = 11 : i64} {
  func.func @_attention_kernel(%arg0: i32, %arg1: memref<128x32xbf16, #tpu.memory_space<vmem>>, %arg2: memref<32x96xbf16, #tpu.memory_space<vmem>>, %arg3: memref<1x96xf32, #tpu.memory_space<vmem>>, %arg4: memref<32x32xbf16, #tpu.memory_space<vmem>>, %arg5: memref<1x32xf32, #tpu.memory_space<vmem>>, %arg6: memref<128x32xbf16, #tpu.memory_space<vmem>>, %arg7: memref<128x8xf32, #tpu.memory_space<vmem>>, %arg8: memref<8x32xf32, #tpu.memory_space<vmem>>, %arg9: memref<128x32xf32, #tpu.memory_space<vmem>>) attributes {dimension_semantics = [#tpu.dimension_semantics<parallel>], iteration_bounds = array<i64: 4>, scalar_prefetch = 0 : i64, scratch_operands = 0 : i64, tpu.core_type = #tpu.core_type<tc>, window_params = [{transform_indices = @transform_0, window_bounds = array<i64: 128, 32>}, {pipeline_mode = #tpu.pipeline_mode<synchronous>, transform_indices = @transform_1, window_bounds = array<i64: 32, 96>}, {pipeline_mode = #tpu.pipeline_mode<synchronous>, transform_indices = @transform_2, window_bounds = array<i64: 1, 96>}, {pipeline_mode = #tpu.pipeline_mode<synchronous>, transform_indices = @transform_3, window_bounds = array<i64: 32, 32>}, {pipeline_mode = #tpu.pipeline_mode<synchronous>, transform_indices = @transform_4, window_bounds = array<i64: 1, 32>}, {pipeline_mode = #tpu.pipeline_mode<synchronous>, transform_indices = @transform_5, window_bounds = array<i64: 128, 32>}, {pipeline_mode = #tpu.pipeline_mode<synchronous>, transform_indices = @transform_6, window_bounds = array<i64: 128, 8>}, {pipeline_mode = #tpu.pipeline_mode<synchronous>, transform_indices = @transform_7, window_bounds = array<i64: 8, 32>}, {transform_indices = @transform_8, window_bounds = array<i64: 128, 32>}]} {
    %c0 = arith.constant 0 : index
    %c0_0 = arith.constant 0 : index
    %0 = vector.load %arg1[%c0, %c0_0] : memref<128x32xbf16, #tpu.memory_space<vmem>>, vector<128x32xbf16>
    %c0_1 = arith.constant 0 : index
    %c0_2 = arith.constant 0 : index
    %1 = vector.load %arg2[%c0_1, %c0_2] : memref<32x96xbf16, #tpu.memory_space<vmem>>, vector<32x96xbf16>
    %cst = arith.constant dense<0.000000e+00> : vector<128x96xf32>
    %2 = tpu.matmul %0, %1, %cst {dimension_numbers = #tpu.dot_dimension_numbers<[1], [0], [0], [1], [0, 0, 1, 1], [], []>} : vector<128x32xbf16>, vector<32x96xbf16>, vector<128x96xf32> -> vector<128x96xf32>
    %c0_3 = arith.constant 0 : index
    %c0_4 = arith.constant 0 : index
    %3 = vector.load %arg3[%c0_3, %c0_4] : memref<1x96xf32, #tpu.memory_space<vmem>>, vector<1x96xf32>
    %4 = vector.broadcast %3 : vector<1x96xf32> to vector<128x96xf32>
    %5 = arith.addf %2, %4 : vector<128x96xf32>
    %6 = vector.extract_strided_slice %5 {offsets = [0, 0], sizes = [128, 32], strides = [1, 1]} : vector<128x96xf32> to vector<128x32xf32>
    %7 = arith.truncf %6 : vector<128x32xf32> to vector<128x32xbf16>
    %8 = vector.shape_cast %7 : vector<128x32xbf16> to vector<8x16x32xbf16>
    %9 = vector.extract_strided_slice %5 {offsets = [0, 32], sizes = [128, 32], strides = [1, 1]} : vector<128x96xf32> to vector<128x32xf32>
    %10 = arith.truncf %9 : vector<128x32xf32> to vector<128x32xbf16>
    %11 = vector.shape_cast %10 : vector<128x32xbf16> to vector<8x16x32xbf16>
    %12 = vector.extract_strided_slice %5 {offsets = [0, 64], sizes = [128, 32], strides = [1, 1]} : vector<128x96xf32> to vector<128x32xf32>
    %13 = arith.truncf %12 : vector<128x32xf32> to vector<128x32xbf16>
    %14 = vector.shape_cast %13 : vector<128x32xbf16> to vector<8x16x32xbf16>
    %c0_5 = arith.constant 0 : index
    %c0_6 = arith.constant 0 : index
    %15 = vector.load %arg6[%c0_5, %c0_6] : memref<128x32xbf16, #tpu.memory_space<vmem>>, vector<128x32xbf16>
    %16 = tpu.concatenate %11, %11, %11, %11, %11, %11, %11, %11 in 1 : vector<8x16x32xbf16>, vector<8x16x32xbf16>, vector<8x16x32xbf16>, vector<8x16x32xbf16>, vector<8x16x32xbf16>, vector<8x16x32xbf16>, vector<8x16x32xbf16>, vector<8x16x32xbf16> -> vector<8x128x32xbf16>
    %17 = vector.shape_cast %15 : vector<128x32xbf16> to vector<1x128x32xbf16>
    %18 = vector.broadcast %17 : vector<1x128x32xbf16> to vector<8x128x32xbf16>
    %19 = arith.mulf %16, %18 : vector<8x128x32xbf16>
    "tpu.trace_start"() <{level = 10 : i32, message = "blc,bsc->bls"}> : () -> ()
    %cst_7 = arith.constant dense<0.000000e+00> : vector<8x16x128xf32>
    %20 = tpu.matmul %8, %19, %cst_7 {dimension_numbers = #tpu.dot_dimension_numbers<[2], [2], [1], [1], [0, 0, 0, 1, 1, 1], [0], [0]>} : vector<8x16x32xbf16>, vector<8x128x32xbf16>, vector<8x16x128xf32> -> vector<8x16x128xf32>
    "tpu.trace_stop"() : () -> ()
    %21 = vector.shape_cast %20 : vector<8x16x128xf32> to vector<128x128xf32>
    %cst_8 = arith.constant dense<0xFF800000> : vector<128xf32>
    %22 = vector.multi_reduction <maximumf>, %21, %cst_8 [1] : vector<128x128xf32> to vector<128xf32>
    %23 = vector.shape_cast %22 : vector<128xf32> to vector<128x1xf32>
    %24 = vector.broadcast %23 : vector<128x1xf32> to vector<128x128xf32>
    %25 = arith.subf %21, %24 : vector<128x128xf32>
    %26 = math.exp %25 : vector<128x128xf32>
    %c0_9 = arith.constant 0 : index
    %c0_10 = arith.constant 0 : index
    %27 = vector.load %arg7[%c0_9, %c0_10] : memref<128x8xf32, #tpu.memory_space<vmem>>, vector<128x8xf32>
    %cst_11 = arith.constant dense<0.000000e+00> : vector<128x8xf32>
    %28 = tpu.matmul %26, %27, %cst_11 {dimension_numbers = #tpu.dot_dimension_numbers<[1], [0], [0], [1], [0, 0, 1, 1], [], []>} : vector<128x128xf32>, vector<128x8xf32>, vector<128x8xf32> -> vector<128x8xf32>
    %29 = tpu.reciprocal %28 {approx = true} : vector<128x8xf32> -> vector<128x8xf32>
    %c0_12 = arith.constant 0 : index
    %c0_13 = arith.constant 0 : index
    %30 = vector.load %arg8[%c0_12, %c0_13] : memref<8x32xf32, #tpu.memory_space<vmem>>, vector<8x32xf32>
    %cst_14 = arith.constant dense<0.000000e+00> : vector<128x32xf32>
    %31 = tpu.matmul %29, %30, %cst_14 {dimension_numbers = #tpu.dot_dimension_numbers<[1], [0], [0], [1], [0, 0, 1, 1], [], []>} : vector<128x8xf32>, vector<8x32xf32>, vector<128x32xf32> -> vector<128x32xf32>
    %32 = tpu.concatenate %14, %14, %14, %14, %14, %14, %14, %14 in 1 : vector<8x16x32xbf16>, vector<8x16x32xbf16>, vector<8x16x32xbf16>, vector<8x16x32xbf16>, vector<8x16x32xbf16>, vector<8x16x32xbf16>, vector<8x16x32xbf16>, vector<8x16x32xbf16> -> vector<8x128x32xbf16>
    %33 = vector.shape_cast %15 : vector<128x32xbf16> to vector<1x128x32xbf16>
    %34 = vector.broadcast %33 : vector<1x128x32xbf16> to vector<8x128x32xbf16>
    %35 = arith.mulf %32, %34 : vector<8x128x32xbf16>
    %36 = vector.shape_cast %26 : vector<128x128xf32> to vector<8x16x128xf32>
    %37 = arith.truncf %36 : vector<8x16x128xf32> to vector<8x16x128xbf16>
    "tpu.trace_start"() <{level = 10 : i32, message = "bls,bsc->blc"}> : () -> ()
    %cst_15 = arith.constant dense<0.000000e+00> : vector<8x16x32xf32>
    %38 = tpu.matmul %37, %35, %cst_15 {dimension_numbers = #tpu.dot_dimension_numbers<[2], [1], [1], [2], [0, 0, 0, 1, 1, 2], [0], [0]>} : vector<8x16x128xbf16>, vector<8x128x32xbf16>, vector<8x16x32xf32> -> vector<8x16x32xf32>
    "tpu.trace_stop"() : () -> ()
    %39 = vector.shape_cast %38 : vector<8x16x32xf32> to vector<128x32xf32>
    %40 = arith.mulf %39, %31 : vector<128x32xf32>
    %41 = arith.truncf %40 : vector<128x32xf32> to vector<128x32xbf16>
    %c0_16 = arith.constant 0 : index
    %c0_17 = arith.constant 0 : index
    %42 = vector.load %arg4[%c0_16, %c0_17] : memref<32x32xbf16, #tpu.memory_space<vmem>>, vector<32x32xbf16>
    %cst_18 = arith.constant dense<0.000000e+00> : vector<128x32xf32>
    %43 = tpu.matmul %41, %42, %cst_18 {dimension_numbers = #tpu.dot_dimension_numbers<[1], [0], [0], [1], [0, 0, 1, 1], [], []>} : vector<128x32xbf16>, vector<32x32xbf16>, vector<128x32xf32> -> vector<128x32xf32>
    %c0_19 = arith.constant 0 : index
    %c0_20 = arith.constant 0 : index
    %44 = vector.load %arg5[%c0_19, %c0_20] : memref<1x32xf32, #tpu.memory_space<vmem>>, vector<1x32xf32>
    %45 = vector.broadcast %44 : vector<1x32xf32> to vector<128x32xf32>
    %46 = arith.addf %43, %45 : vector<128x32xf32>
    %c0_21 = arith.constant 0 : index
    %c0_22 = arith.constant 0 : index
    %47 = vector.load %arg9[%c0_21, %c0_22] : memref<128x32xf32, #tpu.memory_space<vmem>>, vector<128x32xf32>
    tpu.vector_store %arg9[%c0_21, %c0_22], %46 {strides = array<i32>} : memref<128x32xf32, #tpu.memory_space<vmem>>, vector<128x32xf32>,
    return
  }
  func.func @transform_0(%arg0: i32) -> (i32, i32) {
    %c0_i32 = arith.constant 0 : i32
    %c0_i32_0 = arith.constant 0 : i32
    return %arg0, %c0_i32 : i32, i32
  }
  func.func @transform_1(%arg0: i32) -> (i32, i32) {
    %c0_i32 = arith.constant 0 : i32
    %c0_i32_0 = arith.constant 0 : i32
    %c0_i32_1 = arith.constant 0 : i32
    return %c0_i32, %c0_i32_0 : i32, i32
  }
  func.func @transform_2(%arg0: i32) -> (i32, i32) {
    %c0_i32 = arith.constant 0 : i32
    %c0_i32_0 = arith.constant 0 : i32
    %c0_i32_1 = arith.constant 0 : i32
    return %c0_i32, %c0_i32_0 : i32, i32
  }
  func.func @transform_3(%arg0: i32) -> (i32, i32) {
    %c0_i32 = arith.constant 0 : i32
    %c0_i32_0 = arith.constant 0 : i32
    %c0_i32_1 = arith.constant 0 : i32
    return %c0_i32, %c0_i32_0 : i32, i32
  }
  func.func @transform_4(%arg0: i32) -> (i32, i32) {
    %c0_i32 = arith.constant 0 : i32
    %c0_i32_0 = arith.constant 0 : i32
    %c0_i32_1 = arith.constant 0 : i32
    return %c0_i32, %c0_i32_0 : i32, i32
  }
  func.func @transform_5(%arg0: i32) -> (i32, i32) {
    %c0_i32 = arith.constant 0 : i32
    %c0_i32_0 = arith.constant 0 : i32
    %c0_i32_1 = arith.constant 0 : i32
    return %c0_i32, %c0_i32_0 : i32, i32
  }
  func.func @transform_6(%arg0: i32) -> (i32, i32) {
    %c0_i32 = arith.constant 0 : i32
    %c0_i32_0 = arith.constant 0 : i32
    %c0_i32_1 = arith.constant 0 : i32
    return %c0_i32, %c0_i32_0 : i32, i32
  }
  func.func @transform_7(%arg0: i32) -> (i32, i32) {
    %c0_i32 = arith.constant 0 : i32
    %c0_i32_0 = arith.constant 0 : i32
    %c0_i32_1 = arith.constant 0 : i32
    return %c0_i32, %c0_i32_0 : i32, i32
  }
  func.func @transform_8(%arg0: i32) -> (i32, i32) {
    %c0_i32 = arith.constant 0 : i32
    %c0_i32_0 = arith.constant 0 : i32
    return %arg0, %c0_i32 : i32, i32
  }
}

</mosaic_0001>

<bundles_post_ra>
// kernel: tpu_custom_call.1
= control target key start
LH: loop header
LB: loop body
LE: loop exit
PB: predicated region body
PF: predicated region fallthrough
CT: control target
= control target key end

     0   :  { %s3694_s27 = smov 0   ;;  %s4766_s0 = inlined_call_operand.vmem [shape: bf16[512,32], index: 0, kind: input, shape index: {}]   ;;  %s4767_s1 = inlined_call_operand.vmem [shape: bf16[32,96], index: 1, kind: input, shape index: {}]   ;;  %s4768_s2 = inlined_call_operand.vmem [shape: f32[1,96], index: 2, kind: input, shape index: {}]   ;;  %s4769_s3 = inlined_call_operand.vmem [shape: bf16[32,32], index: 3, kind: input, shape index: {}]   ;;  %s4770_s4 = inlined_call_operand.vmem [shape: f32[1,32], index: 4, kind: input, shape index: {}]   ;;  %s4771_s5 = inlined_call_operand.vmem [shape: bf16[128,32], index: 5, kind: input, shape index: {}]   ;;  %s4772_s6 = inlined_call_operand.vmem [shape: f32[128,8], index: 6, kind: input, shape index: {}]   ;;  %s4773_s7 = inlined_call_operand.vmem [shape: f32[8,32], index: 7, kind: input, shape index: {}]   ;;  %s4774_s8 = inlined_call_operand.vmem [shape: f32[512,32], index: 8, kind: output, shape index: {}]  }
   0x1 LB: > { %s2771_s28 = sadd.s32 4294967295, %s3642_s27   ;;  %p2775_p0 = scmp.ge.s32.totalorder %s3642_s27, 1  ;;  %s3642_s27 = sphi %s3694_s27, %s18_s27  }
   0x2   : > { %p263_p1 = scmp.lt.s32.totalorder %s3642_s27, 5 }
   0x4   : > { %p264_p2 = pnand %p2775_p0, %p263_p1 }
   0x5   : > { %v3544_v0 = vld [vmem:[%s4767_s1] sm:$0xff] (!%p264_p2)   ;;  %s2776_s9 = sshll.u32 (!%p264_p2), %s2771_s28, 4  ;;  %v3545_v1 = vld [vmem:[%s4767_s1 + $0x8] sm:$0xff] (!%p264_p2)   ;;  %v3554_v2 = vld [vmem:[%s4771_s5 + $0x10] sm:$0xff] (!%p264_p2)   ;;  %s3644_s19 = smov (!%p264_p2), 32   ;;  %vm389_vm0 = vcmask (!%p264_p2), 261120  }
   0x6   : > { %267 = sbr.rel (%p264_p2) target bundleno = 1747 (0x6d3), region = 52  ;;  %p298_p3 = scmp.lt.s32.totalorder (!%p264_p2), %s2776_s9, 63  ;;  %3057 = vmatprep.subr.bf16.mxu1 (!%p264_p2), %v3544_v0  ;;  %v3555_v3 = vld [vmem:[%s4771_s5] sm:$0xff] (!%p264_p2)   ;;  %v3556_v4 = vld [vmem:[%s4771_s5 + $0x18] sm:$0xff] (!%p264_p2)   ;;  %579 = vrot.lane.b32.xlu1 (!%p264_p2), %v3554_v2, %s3644_s19  ;;  %v3557_v5 = vld [vmem:[%s4771_s5 + $0x8] sm:$0xff] (!%p264_p2)   ;;  %v3645_v18 = vmov (!%p264_p2), 0.0  }
   0x7   : > { %3058 = vmatpush3.bf16.msra.mxu1 (!%p264_p2), %v3544_v0  ;;  %575 = vrot.lane.b32.xlu0 (!%p264_p2), %v3555_v3, %s3644_s19  ;;  %v3558_v11 = vld [vmem:[%s4771_s5 + $0x28] sm:$0xff] (!%p264_p2)   ;;  %v3559_v12 = vld [vmem:[%s4771_s5 + $0x20] sm:$0xff] (!%p264_p2)   ;;  %v3560_v13 = vld [vmem:[%s4771_s5 + $0x38] sm:$0xff] (!%p264_p2)   ;;  %s3646_s15 = smov (!%p264_p2), 96   ;;  %vm3647_vm1 = vmmov (!%p264_p2), 0   ;;  %s3648_s10 = smov (!%p264_p2), 64  }
   0x8   : > { %3059 = vmatprep.subr.bf16.mxu1 (!%p264_p2), %v3545_v1  ;;  %v3561_v14 = vld [vmem:[%s4771_s5 + $0x30] sm:$0xff] (!%p264_p2)   ;;  %3097 = vmatprep.subr.bf16.mxu0 (!%p264_p2), %v3645_v18  ;;  %v3751_v20 = vld [vmem:[%s4768_s2] ss:$0 sm:$0xff] (!%p264_p2)  ;;  %vm1657_vm2 = vcmask (!%p264_p2), 64512  }
   0x9   : > { %3113 = vmatprep.mubr.msk.bf16.mxu0 (!%p264_p2), %vm3647_vm1, %v3645_v18 }
   0xa   : > { %581 = vrot.lane.b32.xlu1 (!%p264_p2), %v3556_v4, %s3644_s19 }
   0xb   : > { %3060 = vmatpush3.bf16.msra.mxu1 (!%p264_p2), %v3545_v1  ;;  %577 = vrot.lane.b32.xlu0 (!%p264_p2), %v3557_v5, %s3644_s19 }
   0xc   : > { %3077 = vmatprep.subr.bf16.mxu1 (!%p264_p2), %v3645_v18 }
   0xd   : > { %s4776_s9 = smov (!%p298_p3, %s2776_s9), 63 }
   0xe   : > { %s2777_s18 = sshll.u32 %s4776_s9, 2  ;;  %585 = vrot.lane.b32.xlu1 %v3558_v11, %s3644_s19  ;;  %s2779_s11 = sshll.u32 %s4776_s9, 3 }
   0xf   : > { %s301_s22 = scalar_lea.vmem %s4766_s0, %s2777_s18  ;;  %583 = vrot.lane.b32.xlu0 %v3559_v12, %s3644_s19  ;;  %s4729_s16 = scalar_lea.vmem %s4774_s8, %s2779_s11 }
  0x10   : > { %v3546_v6 = vld [vmem:[%s301_s22] sm:$0xff]   ;;  %v3547_v7 = vld [vmem:[%s301_s22 + $0x8] sm:$0xff]   ;;  %v3548_v8 = vld [vmem:[%s301_s22 + $0x10] sm:$0xff]  }
  0x11   : > { %3061 = vmatprep.mubr.msk.bf16.mxu1 %vm389_vm0, %v3546_v6  ;;  %v3549_v9 = vld [vmem:[%s301_s22 + $0x18] sm:$0xff]   ;;  %v3550_v10 = vld [vmem:[%s301_s22 + $0x20] sm:$0xff]   ;;  %v3551_v15 = vld [vmem:[%s301_s22 + $0x28] sm:$0xff]  }
  0x12   : > { %3062 = vmatmul.mubr.msk.bf16.vlgmr.msra.gmra.mrb[0].mxu1 %vm389_vm0, %v3547_v7  ;;  %589 = vrot.lane.b32.xlu1 %v3560_v13, %s3644_s19  ;;  %v3552_v16 = vld [vmem:[%s301_s22 + $0x30] sm:$0xff]   ;;  %v3553_v17 = vld [vmem:[%s301_s22 + $0x38] sm:$0xff]  }
  0x13   : > { %3065 = vmatprep.mubr.msk.bf16.mxu1 %vm389_vm0, %v3548_v8  ;;  %587 = vrot.lane.b32.xlu0 %v3561_v14, %s3644_s19 }
  0x1a   : > { %3066 = vmatmul.mubr.msk.bf16.gmra.mrb[4].mxu1 %vm389_vm0, %v3549_v9 }
  0x1b   : > { %3069 = vmatprep.mubr.msk.bf16.mxu1 %vm389_vm0, %v3550_v10 }
  0x22   : > { %3070 = vmatmul.mubr.msk.bf16.gmra.mrb[8].mxu1 %vm389_vm0, %v3551_v15 }
  0x23   : > { %3073 = vmatprep.mubr.msk.bf16.mxu1 %vm389_vm0, %v3552_v16 }
  0x2a   : > { %3074 = vmatmul.mubr.msk.bf16.gmra.mrb[12].mxu1 %vm389_vm0, %v3553_v17 }
  0x2b   : > { %3093 = vmatprep.mubr.msk.bf16.mxu1 %vm3647_vm1, %v3645_v18 }
  0x78   : > { %v3776_v42 = vpop.permute.xlu1 %579 }
  0x79   : > { %v3755_v26 = vpop.permute.xlu0 %575 }
  0x7c   : > { %v3793_v52 = vpop.permute.xlu1 %581 }
  0x7d   : > { %v3769_v36 = vpop.permute.xlu0 %577 }
  0x80   : > { %v3817_v4 = vpop.permute.xlu1 %585 }
  0x81   : > { %v3806_v61 = vpop.permute.xlu0 %583 }
  0x84   : > { %v3837_v16 = vpop.permute.xlu1 %589 }
  0x85   : > { %v3824_v10 = vpop.permute.xlu0 %587 }
  0xe5   : > { %v3063_v19 = vpop.f32.mrb[0].mxu1 }
  0xe6   : > { %v448_v21 = vpop.f32.mrb[1].mxu1  ;;  %v457_v23 = vadd.f32 %v3063_v19, %v3751_v20 }
  0xe7   : > { %v3064_v22 = vpop.f32.mrb[2].mxu1  ;;  %v449_v27 = vadd.f32 %v3751_v20, %v448_v21 }
  0xe8   : > { %v460_v24 = vadd.f32 %v3064_v22, %v3751_v20  ;;  %v451_v25 = vpop.f32.mrb[3].mxu1 }
  0xe9   : > { %v452_v28 = vadd.f32 %v3751_v20, %v451_v25 }
  0xea   : > { %v3759_v29 = vpack.c.bf16 %v460_v24, %v457_v23 }
  0xeb   : > { %v3761_v30 = vpack.c.bf16 %v452_v28, %v449_v27 }
  0xec   : > { %v607_v31 = vmul.bf16 %v3755_v26, %v3759_v29  ;;  %v608_v41 = vmul.bf16 %v3769_v36, %v3759_v29  ;;  %v609_v47 = vmul.bf16 %v3776_v42, %v3759_v29  ;;  %v610_v57 = vmul.bf16 %v3793_v52, %v3759_v29 }
  0xed   : > { %v3067_v32 = vpop.f32.mrb[4].mxu1  ;;  %v599_v33 = vmul.bf16 %v3755_v26, %v3761_v30  ;;  %v600_v44 = vmul.bf16 %v3769_v36, %v3761_v30  ;;  %v601_v49 = vmul.bf16 %v3776_v42, %v3761_v30  ;;  %v602_v59 = vmul.bf16 %v3793_v52, %v3761_v30 }
  0xee   : > { %v473_v34 = vadd.f32 %v3067_v32, %v3751_v20  ;;  %763 = vrot.lane.b32.xlu1 %v607_v31, %s3646_s15  ;;  %v464_v35 = vpop.f32.mrb[5].mxu1  ;;  %v611_v63 = vmul.bf16 %v3806_v61, %v3759_v29  ;;  %v603_v1 = vmul.bf16 %v3806_v61, %v3761_v30  ;;  %v612_v9 = vmul.bf16 %v3817_v4, %v3759_v29 }
  0xef   : > { %v465_v37 = vadd.f32 %v3751_v20, %v464_v35  ;;  %v3068_v38 = vpop.f32.mrb[6].mxu1  ;;  %671 = vrot.lane.b32.xlu0 %v599_v33, %s3646_s15  ;;  %v604_v12 = vmul.bf16 %v3817_v4, %v3761_v30  ;;  %v613_v15 = vmul.bf16 %v3824_v10, %v3759_v29  ;;  %v605_v17 = vmul.bf16 %v3824_v10, %v3761_v30 }
  0xf0   : > { %v476_v39 = vadd.f32 %v3068_v38, %v3751_v20  ;;  %v467_v40 = vpop.f32.mrb[7].mxu1  ;;  %v614_v19 = vmul.bf16 %v3837_v16, %v3759_v29 }
  0xf1   : > { %v468_v43 = vadd.f32 %v3751_v20, %v467_v40 }
  0xf2   : > { %v3781_v45 = vpack.c.bf16 %v476_v39, %v473_v34  ;;  %765 = vrot.lane.b32.xlu1 %v608_v41, %s3646_s15 }
  0xf3   : > { %v3784_v46 = vpack.c.bf16 %v468_v43, %v465_v37  ;;  %673 = vrot.lane.b32.xlu0 %v600_v44, %s3646_s15 }
  0xf4   : > { %v623_v21 = vmul.bf16 %v3755_v26, %v3781_v45  ;;  %v624_v23 = vmul.bf16 %v3769_v36, %v3781_v45  ;;  %v625_v25 = vmul.bf16 %v3776_v42, %v3781_v45  ;;  %v626_v28 = vmul.bf16 %v3793_v52, %v3781_v45 }
  0xf5   : > { %v3071_v48 = vpop.f32.mrb[8].mxu1  ;;  %v615_v22 = vmul.bf16 %v3755_v26, %v3784_v46  ;;  %v616_v24 = vmul.bf16 %v3769_v36, %v3784_v46  ;;  %v617_v27 = vmul.bf16 %v3776_v42, %v3784_v46  ;;  %v618_v31 = vmul.bf16 %v3793_v52, %v3784_v46 }
  0xf6   : > { %v489_v50 = vadd.f32 %v3071_v48, %v3751_v20  ;;  %767 = vrot.lane.b32.xlu1 %v609_v47, %s3646_s15  ;;  %v480_v51 = vpop.f32.mrb[9].mxu1  ;;  %v627_v32 = vmul.bf16 %v3806_v61, %v3781_v45  ;;  %v619_v33 = vmul.bf16 %v3806_v61, %v3784_v46  ;;  %v628_v34 = vmul.bf16 %v3817_v4, %v3781_v45 }
  0xf7   : > { %v481_v53 = vadd.f32 %v3751_v20, %v480_v51  ;;  %v3072_v54 = vpop.f32.mrb[10].mxu1  ;;  %675 = vrot.lane.b32.xlu0 %v601_v49, %s3646_s15  ;;  %v620_v35 = vmul.bf16 %v3817_v4, %v3784_v46  ;;  %v629_v37 = vmul.bf16 %v3824_v10, %v3781_v45  ;;  %v621_v38 = vmul.bf16 %v3824_v10, %v3784_v46 }
  0xf8   : > { %v492_v55 = vadd.f32 %v3072_v54, %v3751_v20  ;;  %v483_v56 = vpop.f32.mrb[11].mxu1  ;;  %v630_v39 = vmul.bf16 %v3837_v16, %v3781_v45  ;;  %v622_v40 = vmul.bf16 %v3837_v16, %v3784_v46 }
  0xf9   : > { %v484_v58 = vadd.f32 %v3751_v20, %v483_v56 }
  0xfa   : > { %v3803_v60 = vpack.c.bf16 %v492_v55, %v489_v50  ;;  %769 = vrot.lane.b32.xlu1 %v610_v57, %s3646_s15 }
  0xfb   : > { %v3808_v62 = vpack.c.bf16 %v484_v58, %v481_v53  ;;  %677 = vrot.lane.b32.xlu0 %v602_v59, %s3646_s15 }
  0xfc   : > { %v639_v41 = vmul.bf16 %v3755_v26, %v3803_v60  ;;  %v640_v44 = vmul.bf16 %v3769_v36, %v3803_v60  ;;  %v641_v48 = vmul.bf16 %v3776_v42, %v3803_v60  ;;  %v642_v50 = vmul.bf16 %v3793_v52, %v3803_v60 }
  0xfd   : > { %v3075_v0 = vpop.f32.mrb[12].mxu1  ;;  %v631_v43 = vmul.bf16 %v3755_v26, %v3808_v62  ;;  %v632_v47 = vmul.bf16 %v3769_v36, %v3808_v62  ;;  %v633_v49 = vmul.bf16 %v3776_v42, %v3808_v62  ;;  %v634_v51 = vmul.bf16 %v3793_v52, %v3808_v62 }
  0xfe   : > { %v505_v2 = vadd.f32 %v3075_v0, %v3751_v20  ;;  %771 = vrot.lane.b32.xlu1 %v611_v63, %s3646_s15  ;;  %v496_v3 = vpop.f32.mrb[13].mxu1  ;;  %v643_v53 = vmul.bf16 %v3806_v61, %v3803_v60  ;;  %v635_v54 = vmul.bf16 %v3806_v61, %v3808_v62  ;;  %v644_v55 = vmul.bf16 %v3817_v4, %v3803_v60 }
  0xff   : > { %v497_v5 = vadd.f32 %v3751_v20, %v496_v3  ;;  %v3076_v6 = vpop.f32.mrb[14].mxu1  ;;  %679 = vrot.lane.b32.xlu0 %v603_v1, %s3646_s15  ;;  %v636_v56 = vmul.bf16 %v3817_v4, %v3808_v62  ;;  %v645_v57 = vmul.bf16 %v3824_v10, %v3803_v60  ;;  %v637_v58 = vmul.bf16 %v3824_v10, %v3808_v62 }
 0x100   : > { %v508_v7 = vadd.f32 %v3076_v6, %v3751_v20  ;;  %v499_v8 = vpop.f32.mrb[15].mxu1  ;;  %v646_v59 = vmul.bf16 %v3837_v16, %v3803_v60  ;;  %v638_v63 = vmul.bf16 %v3837_v16, %v3808_v62 }
 0x101   : > { %v500_v11 = vadd.f32 %v3751_v20, %v499_v8  ;;  %v606_v20 = vmul.bf16 %v3837_v16, %v3761_v30 }
 0x102   : > { %v3829_v13 = vpack.c.bf16 %v508_v7, %v505_v2  ;;  %773 = vrot.lane.b32.xlu1 %v612_v9, %s3646_s15 }
 0x103   : > { %v3832_v14 = vpack.c.bf16 %v500_v11, %v497_v5  ;;  %681 = vrot.lane.b32.xlu0 %v604_v12, %s3646_s15 }
 0x104   : > { %v655_v0 = vmul.bf16 %v3755_v26, %v3829_v13  ;;  %v656_v2 = vmul.bf16 %v3769_v36, %v3829_v13  ;;  %v657_v5 = vmul.bf16 %v3776_v42, %v3829_v13  ;;  %v658_v6 = vmul.bf16 %v3793_v52, %v3829_v13 }
 0x105   : > { %v647_v1 = vmul.bf16 %v3755_v26, %v3832_v14  ;;  %v648_v3 = vmul.bf16 %v3769_v36, %v3832_v14  ;;  %v649_v26 = vmul.bf16 %v3776_v42, %v3832_v14  ;;  %v650_v36 = vmul.bf16 %v3793_v52, %v3832_v14 }
 0x106   : > { %775 = vrot.lane.b32.xlu1 %v613_v15, %s3646_s15  ;;  %v659_v7 = vmul.bf16 %v3806_v61, %v3829_v13  ;;  %v651_v42 = vmul.bf16 %v3806_v61, %v3832_v14  ;;  %v660_v9 = vmul.bf16 %v3817_v4, %v3829_v13  ;;  %v652_v12 = vmul.bf16 %v3817_v4, %v3832_v14 }
 0x107   : > { %683 = vrot.lane.b32.xlu0 %v605_v17, %s3646_s15  ;;  %v661_v61 = vmul.bf16 %v3824_v10, %v3829_v13  ;;  %v653_v17 = vmul.bf16 %v3824_v10, %v3832_v14 }
 0x10a   : > { %777 = vrot.lane.b32.xlu1 %v614_v19, %s3646_s15 }
 0x10b   : > { %685 = vrot.lane.b32.xlu0 %v606_v20, %s3646_s15  ;;  %v662_v20 = vmul.bf16 %v3837_v16, %v3829_v13 }
 0x10e   : > { %947 = vrot.lane.b32.xlu1 %v623_v21, %s3646_s15 }
 0x10f   : > { %855 = vrot.lane.b32.xlu0 %v615_v22, %s3646_s15  ;;  %v654_v22 = vmul.bf16 %v3837_v16, %v3832_v14 }
 0x112   : > { %949 = vrot.lane.b32.xlu1 %v624_v23, %s3646_s15 }
 0x113   : > { %857 = vrot.lane.b32.xlu0 %v616_v24, %s3646_s15 }
 0x116   : > { %951 = vrot.lane.b32.xlu1 %v625_v25, %s3646_s15 }
 0x117   : > { %859 = vrot.lane.b32.xlu0 %v617_v27, %s3646_s15 }
 0x11a   : > { %953 = vrot.lane.b32.xlu1 %v626_v28, %s3646_s15 }
 0x11b   : > { %861 = vrot.lane.b32.xlu0 %v618_v31, %s3646_s15 }
 0x11e   : > { %955 = vrot.lane.b32.xlu1 %v627_v32, %s3646_s15 }
 0x11f   : > { %863 = vrot.lane.b32.xlu0 %v619_v33, %s3646_s15 }
 0x122   : > { %957 = vrot.lane.b32.xlu1 %v628_v34, %s3646_s15 }
 0x123   : > { %865 = vrot.lane.b32.xlu0 %v620_v35, %s3646_s15 }
 0x126   : > { %959 = vrot.lane.b32.xlu1 %v629_v37, %s3646_s15 }
 0x127   : > { %867 = vrot.lane.b32.xlu0 %v621_v38, %s3646_s15 }
 0x12a   : > { %961 = vrot.lane.b32.xlu1 %v630_v39, %s3646_s15 }
 0x12b   : > { %869 = vrot.lane.b32.xlu0 %v622_v40, %s3646_s15 }
 0x12e   : > { %1131 = vrot.lane.b32.xlu1 %v639_v41, %s3646_s15 }
 0x12f   : > { %1039 = vrot.lane.b32.xlu0 %v631_v43, %s3646_s15 }
 0x132   : > { %1133 = vrot.lane.b32.xlu1 %v640_v44, %s3646_s15 }
 0x133   : > { %1041 = vrot.lane.b32.xlu0 %v632_v47, %s3646_s15 }
 0x136   : > { %1135 = vrot.lane.b32.xlu1 %v641_v48, %s3646_s15 }
 0x137   : > { %1043 = vrot.lane.b32.xlu0 %v633_v49, %s3646_s15 }
 0x13a   : > { %1137 = vrot.lane.b32.xlu1 %v642_v50, %s3646_s15 }
 0x13b   : > { %1045 = vrot.lane.b32.xlu0 %v634_v51, %s3646_s15 }
 0x13e   : > { %1139 = vrot.lane.b32.xlu1 %v643_v53, %s3646_s15 }
 0x13f   : > { %1047 = vrot.lane.b32.xlu0 %v635_v54, %s3646_s15 }
 0x142   : > { %1141 = vrot.lane.b32.xlu1 %v644_v55, %s3646_s15 }
 0x143   : > { %1049 = vrot.lane.b32.xlu0 %v636_v56, %s3646_s15 }
 0x146   : > { %1143 = vrot.lane.b32.xlu1 %v645_v57, %s3646_s15 }
 0x147   : > { %1051 = vrot.lane.b32.xlu0 %v637_v58, %s3646_s15 }
 0x14a   : > { %1145 = vrot.lane.b32.xlu1 %v646_v59, %s3646_s15 }
 0x14b   : > { %1053 = vrot.lane.b32.xlu0 %v638_v63, %s3646_s15 }
 0x14e   : > { %1315 = vrot.lane.b32.xlu1 %v655_v0, %s3646_s15 }
 0x14f   : > { %1223 = vrot.lane.b32.xlu0 %v647_v1, %s3646_s15 }
 0x152   : > { %1317 = vrot.lane.b32.xlu1 %v656_v2, %s3646_s15 }
 0x153   : > { %1225 = vrot.lane.b32.xlu0 %v648_v3, %s3646_s15 }
 0x156   : > { %1319 = vrot.lane.b32.xlu1 %v657_v5, %s3646_s15 }
 0x157   : > { %1227 = vrot.lane.b32.xlu0 %v649_v26, %s3646_s15 }
 0x15a   : > { %1321 = vrot.lane.b32.xlu1 %v658_v6, %s3646_s15 }
 0x15b   : > { %1229 = vrot.lane.b32.xlu0 %v650_v36, %s3646_s15 }
 0x15e   : > { %1323 = vrot.lane.b32.xlu1 %v659_v7, %s3646_s15 }
 0x15f   : > { %1231 = vrot.lane.b32.xlu0 %v651_v42, %s3646_s15 }
 0x160   : > { %v764_v8 = vpop.permute.xlu1 %763 }
 0x161   : > { %v672_v11 = vpop.permute.xlu0 %671  ;;  %v783_v52 = vsel %vm389_vm0, %v764_v8, 0 }
 0x162   : > { %v691_v15 = vsel %vm389_vm0, %v672_v11, 0  ;;  %3098 = vmatpush3.bf16.xpose.msra.mxu0 %v783_v52  ;;  %1325 = vrot.lane.b32.xlu1 %v660_v9, %s3646_s15 }
 0x163   : > { %1233 = vrot.lane.b32.xlu0 %v652_v12, %s3646_s15  ;;  %3078 = vmatpush3.bf16.xpose.msra.mxu1 %v691_v15 }
 0x164   : > { %3099 = vmatprep.subr.bf16.mxu0 %v3645_v18  ;;  %3079 = vmatprep.subr.bf16.mxu1 %v3645_v18  ;;  %v766_v19 = vpop.permute.xlu1 %765 }
 0x165   : > { %v674_v4 = vpop.permute.xlu0 %673  ;;  %v786_v21 = vsel %vm389_vm0, %v766_v19, 0 }
 0x166   : > { %1327 = vrot.lane.b32.xlu1 %v661_v61, %s3646_s15  ;;  %v694_v23 = vsel %vm389_vm0, %v674_v4, 0 }
 0x167   : > { %1235 = vrot.lane.b32.xlu0 %v653_v17, %s3646_s15 }
 0x168   : > { %v768_v10 = vpop.permute.xlu1 %767 }
 0x169   : > { %v676_v24 = vpop.permute.xlu0 %675  ;;  %v789_v25 = vsel %vm389_vm0, %v768_v10, 0 }
 0x16a   : > { %3100 = vmatpush3.bf16.xpose.msra.mxu0 %v786_v21  ;;  %1329 = vrot.lane.b32.xlu1 %v662_v20, %s3646_s15  ;;  %v697_v27 = vsel %vm389_vm0, %v676_v24, 0 }
 0x16b   : > { %1237 = vrot.lane.b32.xlu0 %v654_v22, %s3646_s15  ;;  %3080 = vmatpush3.bf16.xpose.msra.mxu1 %v694_v23 }
 0x16c   : > { %3101 = vmatprep.subr.bf16.mxu0 %v3645_v18  ;;  %3081 = vmatprep.subr.bf16.mxu1 %v3645_v18  ;;  %v770_v16 = vpop.permute.xlu1 %769 }
 0x16d   : > { %v678_v28 = vpop.permute.xlu0 %677  ;;  %v792_v31 = vsel %vm389_vm0, %v770_v16, 0 }
 0x16e   : > { %v700_v32 = vsel %vm389_vm0, %v678_v28, 0 }
 0x170   : > { %v772_v33 = vpop.permute.xlu1 %771 }
 0x171   : > { %v680_v34 = vpop.permute.xlu0 %679  ;;  %v795_v35 = vsel %vm389_vm0, %v772_v33, 0 }
 0x172   : > { %3102 = vmatpush3.bf16.xpose.msra.mxu0 %v789_v25  ;;  %v703_v37 = vsel %vm389_vm0, %v680_v34, 0 }
 0x173   : > { %3082 = vmatpush3.bf16.xpose.msra.mxu1 %v697_v27  ;;  %3103 = vmatprep.subr.bf16.mxu0 %v3645_v18 }
 0x174   : > { %3083 = vmatprep.subr.bf16.mxu1 %v3645_v18  ;;  %v774_v38 = vpop.permute.xlu1 %773 }
 0x175   : > { %v682_v39 = vpop.permute.xlu0 %681  ;;  %v798_v40 = vsel %vm389_vm0, %v774_v38, 0 }
 0x176   : > { %v706_v41 = vsel %vm389_vm0, %v682_v39, 0 }
 0x178   : > { %v776_v43 = vpop.permute.xlu1 %775 }
 0x179   : > { %v684_v44 = vpop.permute.xlu0 %683  ;;  %v801_v47 = vsel %vm389_vm0, %v776_v43, 0 }
 0x17a   : > { %3104 = vmatpush3.bf16.xpose.msra.mxu0 %v792_v31  ;;  %v709_v48 = vsel %vm389_vm0, %v684_v44, 0 }
 0x17b   : > { %3084 = vmatpush3.bf16.xpose.msra.mxu1 %v700_v32  ;;  %3105 = vmatprep.subr.bf16.mxu0 %v3645_v18 }
 0x17c   : > { %3085 = vmatprep.subr.bf16.mxu1 %v3645_v18  ;;  %v778_v49 = vpop.permute.xlu1 %777 }
 0x17d   : > { %v686_v50 = vpop.permute.xlu0 %685  ;;  %v804_v51 = vsel %vm389_vm0, %v778_v49, 0 }
 0x17e   : > { %v712_v53 = vsel %vm389_vm0, %v686_v50, 0 }
 0x180   : > { %v948_v54 = vpop.permute.xlu1 %947 }
 0x181   : > { %v856_v55 = vpop.permute.xlu0 %855  ;;  %v967_v56 = vsel %vm389_vm0, %v948_v54, 0 }
 0x182   : > { %3106 = vmatpush3.bf16.xpose.msra.mxu0 %v795_v35  ;;  %v875_v57 = vsel %vm389_vm0, %v856_v55, 0 }
 0x183   : > { %3086 = vmatpush3.bf16.xpose.msra.mxu1 %v703_v37  ;;  %3107 = vmatprep.subr.bf16.mxu0 %v3645_v18 }
 0x184   : > { %3087 = vmatprep.subr.bf16.mxu1 %v3645_v18  ;;  %v950_v58 = vpop.permute.xlu1 %949 }
 0x185   : > { %v858_v59 = vpop.permute.xlu0 %857  ;;  %v970_v63 = vsel %vm389_vm0, %v950_v58, 0 }
 0x186   : > { %v878_v0 = vsel %vm389_vm0, %v858_v59, 0 }
 0x188   : > { %v952_v1 = vpop.permute.xlu1 %951 }
 0x189   : > { %v860_v2 = vpop.permute.xlu0 %859  ;;  %v973_v3 = vsel %vm389_vm0, %v952_v1, 0 }
 0x18a   : > { %3108 = vmatpush3.bf16.xpose.msra.mxu0 %v798_v40  ;;  %v881_v5 = vsel %vm389_vm0, %v860_v2, 0 }
 0x18b   : > { %3088 = vmatpush3.bf16.xpose.msra.mxu1 %v706_v41  ;;  %3109 = vmatprep.subr.bf16.mxu0 %v3645_v18 }
 0x18c   : > { %3089 = vmatprep.subr.bf16.mxu1 %v3645_v18  ;;  %v954_v26 = vpop.permute.xlu1 %953 }
 0x18d   : > { %v862_v6 = vpop.permute.xlu0 %861  ;;  %v976_v36 = vsel %vm389_vm0, %v954_v26, 0 }
 0x18e   : > { %v884_v7 = vsel %vm389_vm0, %v862_v6, 0 }
 0x190   : > { %v956_v42 = vpop.permute.xlu1 %955 }
 0x191   : > { %v864_v8 = vpop.permute.xlu0 %863  ;;  %v979_v9 = vsel %vm389_vm0, %v956_v42, 0 }
 0x192   : > { %3110 = vmatpush3.bf16.xpose.msra.mxu0 %v801_v47  ;;  %v887_v11 = vsel %vm389_vm0, %v864_v8, 0 }
 0x193   : > { %3090 = vmatpush3.bf16.xpose.msra.mxu1 %v709_v48  ;;  %3111 = vmatprep.subr.bf16.mxu0 %v3645_v18 }
 0x194   : > { %3091 = vmatprep.subr.bf16.mxu1 %v3645_v18  ;;  %v958_v52 = vpop.permute.xlu1 %957 }
 0x195   : > { %v866_v12 = vpop.permute.xlu0 %865  ;;  %v982_v15 = vsel %vm389_vm0, %v958_v52, 0 }
 0x196   : > { %v890_v61 = vsel %vm389_vm0, %v866_v12, 0 }
 0x198   : > { %v960_v17 = vpop.permute.xlu1 %959 }
 0x199   : > { %v868_v19 = vpop.permute.xlu0 %867  ;;  %v985_v4 = vsel %vm389_vm0, %v960_v17, 0 }
 0x19a   : > { %3112 = vmatpush3.bf16.xpose.msra.mxu0 %v804_v51  ;;  %v893_v20 = vsel %vm389_vm0, %v868_v19, 0 }
 0x19b   : > { %3092 = vmatpush3.bf16.xpose.msra.mxu1 %v712_v53  ;;  %3137 = vmatprep.subr.bf16.mxu0 %v3645_v18 }
 0x19c   : > { %3117 = vmatprep.subr.bf16.mxu1 %v3645_v18  ;;  %v962_v21 = vpop.permute.xlu1 %961 }
 0x19d   : > { %v870_v22 = vpop.permute.xlu0 %869  ;;  %v988_v23 = vsel %vm389_vm0, %v962_v21, 0 }
 0x19e   : > { %v896_v10 = vsel %vm389_vm0, %v870_v22, 0 }
 0x1a0   : > { %v1132_v24 = vpop.permute.xlu1 %1131 }
 0x1a1   : > { %3114 = vmatmul.mubr.msk.bf16.vlgmr.msra.gmra.mrb[0].mxu0 %vm389_vm0, %v3759_v29  ;;  %v1040_v25 = vpop.permute.xlu0 %1039  ;;  %v1151_v27 = vsel %vm389_vm0, %v1132_v24, 0 }
 0x1a2   : > { %3094 = vmatmul.mubr.msk.bf16.vlgmr.msra.gmra.mrb[16].mxu1 %vm389_vm0, %v3761_v30  ;;  %3138 = vmatpush3.bf16.xpose.msra.mxu0 %v967_v56  ;;  %v1059_v16 = vsel %vm389_vm0, %v1040_v25, 0 }
 0x1a3   : > { %3118 = vmatpush3.bf16.xpose.msra.mxu1 %v875_v57  ;;  %3139 = vmatprep.subr.bf16.mxu0 %v3645_v18 }
 0x1a4   : > { %3119 = vmatprep.subr.bf16.mxu1 %v3645_v18  ;;  %3153 = vmatprep.mubr.msk.bf16.mxu0 %vm3647_vm1, %v3645_v18  ;;  %v1134_v28 = vpop.permute.xlu1 %1133 }
 0x1a5   : > { %3133 = vmatprep.mubr.msk.bf16.mxu1 %vm3647_vm1, %v3645_v18  ;;  %v1042_v31 = vpop.permute.xlu0 %1041  ;;  %v1154_v32 = vsel %vm389_vm0, %v1134_v28, 0 }
 0x1a6   : > { %v1062_v33 = vsel %vm389_vm0, %v1042_v31, 0 }
 0x1a8   : > { %v1136_v34 = vpop.permute.xlu1 %1135 }
 0x1a9   : > { %v1044_v35 = vpop.permute.xlu0 %1043  ;;  %v1157_v37 = vsel %vm389_vm0, %v1136_v34, 0 }
 0x1aa   : > { %3140 = vmatpush3.bf16.xpose.msra.mxu0 %v970_v63  ;;  %v1065_v38 = vsel %vm389_vm0, %v1044_v35, 0 }
 0x1ab   : > { %3120 = vmatpush3.bf16.xpose.msra.mxu1 %v878_v0  ;;  %3141 = vmatprep.subr.bf16.mxu0 %v3645_v18 }
 0x1ac   : > { %3121 = vmatprep.subr.bf16.mxu1 %v3645_v18  ;;  %v1138_v39 = vpop.permute.xlu1 %1137 }
 0x1ad   : > { %v1046_v40 = vpop.permute.xlu0 %1045  ;;  %v1160_v41 = vsel %vm389_vm0, %v1138_v39, 0  ;;  %v1479_v39 = vld [vmem:[%s4772_s6] sm:$0xff] }
 0x1ae   : > { %v1068_v43 = vsel %vm389_vm0, %v1046_v40, 0  ;;  %v1480_v40 = vld [vmem:[%s4772_s6 + $0x8] sm:$0xff] }
 0x1b0   : > { %v1140_v44 = vpop.permute.xlu1 %1139 }
 0x1b1   : > { %v1048_v47 = vpop.permute.xlu0 %1047  ;;  %v1163_v48 = vsel %vm389_vm0, %v1140_v44, 0  ;;  %v3499_v44 = vpack.c.bf16 %v1480_v40, %v1479_v39 }
 0x1b2   : > { %3142 = vmatpush3.bf16.xpose.msra.mxu0 %v973_v3  ;;  %v1071_v49 = vsel %vm389_vm0, %v1048_v47, 0 }
 0x1b3   : > { %3122 = vmatpush3.bf16.xpose.msra.mxu1 %v881_v5  ;;  %3143 = vmatprep.subr.bf16.mxu0 %v3645_v18 }
 0x1b4   : > { %3123 = vmatprep.subr.bf16.mxu1 %v3645_v18  ;;  %v1142_v50 = vpop.permute.xlu1 %1141 }
 0x1b5   : > { %v1050_v51 = vpop.permute.xlu0 %1049  ;;  %v1166_v53 = vsel %vm389_vm0, %v1142_v50, 0  ;;  %v1481_v50 = vld [vmem:[%s4772_s6 + $0x10] sm:$0xff] }
 0x1b6   : > { %v1074_v54 = vsel %vm389_vm0, %v1050_v51, 0  ;;  %v1482_v51 = vld [vmem:[%s4772_s6 + $0x18] sm:$0xff] }
 0x1b8   : > { %v1144_v55 = vpop.permute.xlu1 %1143 }
 0x1b9   : > { %v1052_v56 = vpop.permute.xlu0 %1051  ;;  %v1169_v57 = vsel %vm389_vm0, %v1144_v55, 0  ;;  %v1484_v55 = vld [vmem:[%s4772_s6 + $0x28] sm:$0xff] }
 0x1ba   : > { %3144 = vmatpush3.bf16.xpose.msra.mxu0 %v976_v36  ;;  %v1077_v58 = vsel %vm389_vm0, %v1052_v56, 0  ;;  %v1485_v56 = vld [vmem:[%s4772_s6 + $0x30] sm:$0xff] }
 0x1bb   : > { %3124 = vmatpush3.bf16.xpose.msra.mxu1 %v884_v7  ;;  %3145 = vmatprep.subr.bf16.mxu0 %v3645_v18 }
 0x1bc   : > { %3125 = vmatprep.subr.bf16.mxu1 %v3645_v18  ;;  %v1146_v59 = vpop.permute.xlu1 %1145 }
 0x1bd   : > { %v1054_v63 = vpop.permute.xlu0 %1053  ;;  %v1172_v0 = vsel %vm389_vm0, %v1146_v59, 0 }
 0x1be   : > { %v1080_v1 = vsel %vm389_vm0, %v1054_v63, 0  ;;  %v1487_v63 = vld [vmem:[%s4772_s6 + $0x40] sm:$0xff] }
 0x1c0   : > { %v1316_v2 = vpop.permute.xlu1 %1315 }
 0x1c1   : > { %v1224_v3 = vpop.permute.xlu0 %1223  ;;  %v1335_v5 = vsel %vm389_vm0, %v1316_v2, 0  ;;  %v1489_v2 = vld [vmem:[%s4772_s6 + $0x50] sm:$0xff] }
 0x1c2   : > { %3146 = vmatpush3.bf16.xpose.msra.mxu0 %v979_v9  ;;  %v1243_v26 = vsel %vm389_vm0, %v1224_v3, 0  ;;  %v1490_v3 = vld [vmem:[%s4772_s6 + $0x58] sm:$0xff] }
 0x1c3   : > { %3126 = vmatpush3.bf16.xpose.msra.mxu1 %v887_v11  ;;  %3147 = vmatprep.subr.bf16.mxu0 %v3645_v18 }
 0x1c4   : > { %3127 = vmatprep.subr.bf16.mxu1 %v3645_v18  ;;  %v1318_v6 = vpop.permute.xlu1 %1317 }
 0x1c5   : > { %v1226_v36 = vpop.permute.xlu0 %1225  ;;  %v1338_v7 = vsel %vm389_vm0, %v1318_v6, 0  ;;  %v1492_v6 = vld [vmem:[%s4772_s6 + $0x68] sm:$0xff] }
 0x1c6   : > { %v1246_v42 = vsel %vm389_vm0, %v1226_v36, 0 }
 0x1c8   : > { %v1320_v8 = vpop.permute.xlu1 %1319 }
 0x1c9   : > { %v1228_v9 = vpop.permute.xlu0 %1227  ;;  %v1341_v11 = vsel %vm389_vm0, %v1320_v8, 0 }
 0x1ca   : > { %3148 = vmatpush3.bf16.xpose.msra.mxu0 %v982_v15  ;;  %v1249_v52 = vsel %vm389_vm0, %v1228_v9, 0 }
 0x1cb   : > { %3128 = vmatpush3.bf16.xpose.msra.mxu1 %v890_v61  ;;  %3149 = vmatprep.subr.bf16.mxu0 %v3645_v18 }
 0x1cc   : > { %3129 = vmatprep.subr.bf16.mxu1 %v3645_v18  ;;  %v1322_v12 = vpop.permute.xlu1 %1321 }
 0x1cd   : > { %v1230_v15 = vpop.permute.xlu0 %1229  ;;  %v1344_v61 = vsel %vm389_vm0, %v1322_v12, 0 }
 0x1ce   : > { %v1252_v17 = vsel %vm389_vm0, %v1230_v15, 0 }
 0x1d0   : > { %v1324_v19 = vpop.permute.xlu1 %1323 }
 0x1d2   : > { %3150 = vmatpush3.bf16.xpose.msra.mxu0 %v985_v4  ;;  %v1232_v4 = vpop.permute.xlu0 %1231 }
 0x1d3   : > { %3130 = vmatpush3.bf16.xpose.msra.mxu1 %v893_v20  ;;  %3151 = vmatprep.subr.bf16.mxu0 %v3645_v18  ;;  %v1347_v20 = vsel %vm389_vm0, %v1324_v19, 0  ;;  %v1255_v21 = vsel %vm389_vm0, %v1232_v4, 0 }
 0x1d4   : > { %3131 = vmatprep.subr.bf16.mxu1 %v3645_v18  ;;  %v1326_v22 = vpop.permute.xlu1 %1325 }
 0x1d8   : > { %v1328_v25 = vpop.permute.xlu1 %1327 }
 0x1da   : > { %3152 = vmatpush3.bf16.xpose.msra.mxu0 %v988_v23  ;;  %v1234_v23 = vpop.permute.xlu0 %1233 }
 0x1db   : > { %3132 = vmatpush3.bf16.xpose.msra.mxu1 %v896_v10  ;;  %3177 = vmatprep.subr.bf16.mxu0 %v3645_v18  ;;  %v1350_v10 = vsel %vm389_vm0, %v1326_v22, 0  ;;  %v1258_v24 = vsel %vm389_vm0, %v1234_v23, 0 }
 0x1dc   : > { %3157 = vmatprep.subr.bf16.mxu1 %v3645_v18  ;;  %v1330_v31 = vpop.permute.xlu1 %1329 }
 0x1e1   : > { %3154 = vmatmul.mubr.msk.bf16.vlgmr.msra.gmra.mrb[4].mxu0 %vm389_vm0, %v3781_v45 }
 0x1e2   : > { %3134 = vmatmul.mubr.msk.bf16.vlgmr.msra.gmra.mrb[20].mxu1 %vm389_vm0, %v3784_v46  ;;  %3178 = vmatpush3.bf16.xpose.msra.mxu0 %v1151_v27  ;;  %v1236_v27 = vpop.permute.xlu0 %1235 }
 0x1e3   : > { %3158 = vmatpush3.bf16.xpose.msra.mxu1 %v1059_v16  ;;  %3179 = vmatprep.subr.bf16.mxu0 %v3645_v18  ;;  %v1353_v16 = vsel %vm389_vm0, %v1328_v25, 0  ;;  %v1261_v28 = vsel %vm389_vm0, %v1236_v27, 0 }
 0x1e4   : > { %3159 = vmatprep.subr.bf16.mxu1 %v3645_v18  ;;  %3193 = vmatprep.mubr.msk.bf16.mxu0 %vm3647_vm1, %v3645_v18 }
 0x1e5   : > { %3173 = vmatprep.mubr.msk.bf16.mxu1 %vm3647_vm1, %v3645_v18 }
 0x1ea   : > { %3180 = vmatpush3.bf16.xpose.msra.mxu0 %v1154_v32  ;;  %v1238_v32 = vpop.permute.xlu0 %1237 }
 0x1eb   : > { %3160 = vmatpush3.bf16.xpose.msra.mxu1 %v1062_v33  ;;  %3181 = vmatprep.subr.bf16.mxu0 %v3645_v18  ;;  %v1356_v33 = vsel %vm389_vm0, %v1330_v31, 0  ;;  %v1264_v34 = vsel %vm389_vm0, %v1238_v32, 0 }
 0x1ec   : > { %3161 = vmatprep.subr.bf16.mxu1 %v3645_v18 }
 0x1f2   : > { %3182 = vmatpush3.bf16.xpose.msra.mxu0 %v1157_v37 }
 0x1f3   : > { %3162 = vmatpush3.bf16.xpose.msra.mxu1 %v1065_v38  ;;  %3183 = vmatprep.subr.bf16.mxu0 %v3645_v18 }
 0x1f4   : > { %3163 = vmatprep.subr.bf16.mxu1 %v3645_v18 }
 0x1fa   : > { %3184 = vmatpush3.bf16.xpose.msra.mxu0 %v1160_v41 }
 0x1fb   : > { %3164 = vmatpush3.bf16.xpose.msra.mxu1 %v1068_v43  ;;  %3185 = vmatprep.subr.bf16.mxu0 %v3645_v18 }
 0x1fc   : > { %3165 = vmatprep.subr.bf16.mxu1 %v3645_v18 }
 0x202   : > { %3186 = vmatpush3.bf16.xpose.msra.mxu0 %v1163_v48 }
 0x203   : > { %3166 = vmatpush3.bf16.xpose.msra.mxu1 %v1071_v49  ;;  %3187 = vmatprep.subr.bf16.mxu0 %v3645_v18 }
 0x204   : > { %3167 = vmatprep.subr.bf16.mxu1 %v3645_v18 }
 0x20a   : > { %3188 = vmatpush3.bf16.xpose.msra.mxu0 %v1166_v53  ;;  %v3503_v53 = vpack.c.bf16 %v1482_v51, %v1481_v50 }
 0x20b   : > { %3168 = vmatpush3.bf16.xpose.msra.mxu1 %v1074_v54  ;;  %3189 = vmatprep.subr.bf16.mxu0 %v3645_v18  ;;  %v1483_v54 = vld [vmem:[%s4772_s6 + $0x20] sm:$0xff] }
 0x20c   : > { %3169 = vmatprep.subr.bf16.mxu1 %v3645_v18 }
 0x212   : > { %3190 = vmatpush3.bf16.xpose.msra.mxu0 %v1169_v57  ;;  %v3507_v57 = vpack.c.bf16 %v1484_v55, %v1483_v54 }
 0x213   : > { %3170 = vmatpush3.bf16.xpose.msra.mxu1 %v1077_v58  ;;  %3191 = vmatprep.subr.bf16.mxu0 %v3645_v18  ;;  %v1486_v58 = vld [vmem:[%s4772_s6 + $0x38] sm:$0xff] }
 0x214   : > { %3171 = vmatprep.subr.bf16.mxu1 %v3645_v18  ;;  %v3511_v59 = vpack.c.bf16 %v1486_v58, %v1485_v56 }
 0x21a   : > { %3192 = vmatpush3.bf16.xpose.msra.mxu0 %v1172_v0  ;;  %v1488_v0 = vld [vmem:[%s4772_s6 + $0x48] sm:$0xff] }
 0x21b   : > { %3172 = vmatpush3.bf16.xpose.msra.mxu1 %v1080_v1  ;;  %3217 = vmatprep.subr.bf16.mxu0 %v3645_v18  ;;  %v3515_v1 = vpack.c.bf16 %v1488_v0, %v1487_v63 }
 0x21c   : > { %3197 = vmatprep.subr.bf16.mxu1 %v3645_v18 }
 0x221   : > { %3194 = vmatmul.mubr.msk.bf16.vlgmr.msra.gmra.mrb[8].mxu0 %vm389_vm0, %v3803_v60 }
 0x222   : > { %3174 = vmatmul.mubr.msk.bf16.vlgmr.msra.gmra.mrb[24].mxu1 %vm389_vm0, %v3808_v62  ;;  %3218 = vmatpush3.bf16.xpose.msra.mxu0 %v1335_v5  ;;  %v3519_v5 = vpack.c.bf16 %v1490_v3, %v1489_v2 }
 0x223   : > { %3198 = vmatpush3.bf16.xpose.msra.mxu1 %v1243_v26  ;;  %3219 = vmatprep.subr.bf16.mxu0 %v3645_v18  ;;  %v1491_v26 = vld [vmem:[%s4772_s6 + $0x60] sm:$0xff] }
 0x224   : > { %3199 = vmatprep.subr.bf16.mxu1 %v3645_v18  ;;  %3233 = vmatprep.mubr.msk.bf16.mxu0 %vm3647_vm1, %v3645_v18  ;;  %v3523_v36 = vpack.c.bf16 %v1492_v6, %v1491_v26 }
 0x225   : > { %3213 = vmatprep.mubr.msk.bf16.mxu1 %vm3647_vm1, %v3645_v18 }
 0x22a   : > { %3220 = vmatpush3.bf16.xpose.msra.mxu0 %v1338_v7  ;;  %v1493_v7 = vld [vmem:[%s4772_s6 + $0x70] sm:$0xff] }
 0x22b   : > { %3200 = vmatpush3.bf16.xpose.msra.mxu1 %v1246_v42  ;;  %3221 = vmatprep.subr.bf16.mxu0 %v3645_v18  ;;  %v1494_v42 = vld [vmem:[%s4772_s6 + $0x78] sm:$0xff] }
 0x22c   : > { %3201 = vmatprep.subr.bf16.mxu1 %v3645_v18  ;;  %v3527_v8 = vpack.c.bf16 %v1494_v42, %v1493_v7  ;;  %v3628_v42 = vld [vmem:[%s4771_s5] sm:$0xff]  }
 0x232   : > { %3222 = vmatpush3.bf16.xpose.msra.mxu0 %v1341_v11 }
 0x233   : > { %3202 = vmatpush3.bf16.xpose.msra.mxu1 %v1249_v52  ;;  %3223 = vmatprep.subr.bf16.mxu0 %v3645_v18 }
 0x234   : > { %3203 = vmatprep.subr.bf16.mxu1 %v3645_v18 }
 0x23a   : > { %3224 = vmatpush3.bf16.xpose.msra.mxu0 %v1344_v61 }
 0x23b   : > { %3204 = vmatpush3.bf16.xpose.msra.mxu1 %v1252_v17  ;;  %3225 = vmatprep.subr.bf16.mxu0 %v3645_v18 }
 0x23c   : > { %3205 = vmatprep.subr.bf16.mxu1 %v3645_v18 }
 0x242   : > { %3226 = vmatpush3.bf16.xpose.msra.mxu0 %v1347_v20 }
 0x243   : > { %3206 = vmatpush3.bf16.xpose.msra.mxu1 %v1255_v21  ;;  %3227 = vmatprep.subr.bf16.mxu0 %v3645_v18 }
 0x244   : > { %3207 = vmatprep.subr.bf16.mxu1 %v3645_v18 }
 0x24a   : > { %3228 = vmatpush3.bf16.xpose.msra.mxu0 %v1350_v10 }
 0x24b   : > { %3208 = vmatpush3.bf16.xpose.msra.mxu1 %v1258_v24  ;;  %3229 = vmatprep.subr.bf16.mxu0 %v3645_v18 }
 0x24c   : > { %3209 = vmatprep.subr.bf16.mxu1 %v3645_v18 }
 0x252   : > { %3230 = vmatpush3.bf16.xpose.msra.mxu0 %v1353_v16 }
 0x253   : > { %3210 = vmatpush3.bf16.xpose.msra.mxu1 %v1261_v28  ;;  %3231 = vmatprep.subr.bf16.mxu0 %v3645_v18 }
 0x254   : > { %3211 = vmatprep.subr.bf16.mxu1 %v3645_v18 }
 0x25a   : > { %3232 = vmatpush3.bf16.xpose.msra.mxu0 %v1356_v33 }
 0x25b   : > { %3212 = vmatpush3.bf16.xpose.msra.mxu1 %v1264_v34 }
 0x25c   : > { %3500 = vmatprep.subr.bf16.mxu1 %v3499_v44 }
 0x261   : > { %3234 = vmatmul.mubr.msk.bf16.vlgmr.msra.gmra.mrb[12].mxu0 %vm389_vm0, %v3829_v13 }
 0x262   : > { %3214 = vmatmul.mubr.msk.bf16.vlgmr.msra.gmra.mrb[28].mxu1 %vm389_vm0, %v3832_v14 }
 0x263   : > { %3502 = vmatpush3.bf16.msra.mxu1 %v3499_v44 }
 0x264   : > { %3504 = vmatprep.subr.bf16.mxu1 %v3503_v53 }
 0x267   : > { %3506 = vmatpush3.bf16.msra.mxu1 %v3503_v53 }
 0x268   : > { %3508 = vmatprep.subr.bf16.mxu1 %v3507_v57 }
 0x26b   : > { %3510 = vmatpush3.bf16.msra.mxu1 %v3507_v57 }
 0x26c   : > { %3512 = vmatprep.subr.bf16.mxu1 %v3511_v59 }
 0x26f   : > { %3514 = vmatpush3.bf16.msra.mxu1 %v3511_v59 }
 0x270   : > { %3516 = vmatprep.subr.bf16.mxu1 %v3515_v1 }
 0x273   : > { %3518 = vmatpush3.bf16.msra.mxu1 %v3515_v1 }
 0x274   : > { %v4151_v35 = vpop.f32.mrb[0].mxu0  ;;  %3520 = vmatprep.subr.bf16.mxu1 %v3519_v5 }
 0x275   : > { %v4153_v37 = vpop.f32.mrb[16].mxu1  ;;  %v3115_v38 = vpop.f32.mrb[1].mxu0 }
 0x276   : > { %v4161_v41 = vpop.f32.mrb[2].mxu0  ;;  %1399 = vmax.xlane.f32.xlu0 %v4153_v37  ;;  %v3095_v43 = vpop.f32.mrb[17].mxu1 }
 0x277   : > { %v4164_v47 = vpop.f32.mrb[18].mxu1  ;;  %v3116_v48 = vpop.f32.mrb[3].mxu0  ;;  %3522 = vmatpush3.bf16.msra.mxu1 %v3519_v5 }
 0x278   : > { %1401 = vmax.xlane.f32.xlu1 %v4164_v47  ;;  %v3096_v49 = vpop.f32.mrb[19].mxu1  ;;  %3524 = vmatprep.subr.bf16.mxu1 %v3523_v36 }
 0x27a   : > { %1403 = vmax.xlane.f32.xlu0 %v4151_v35 }
 0x27b   : > { %3526 = vmatpush3.bf16.msra.mxu1 %v3523_v36 }
 0x27c   : > { %3528 = vmatprep.subr.bf16.mxu1 %v3527_v8 }
 0x27e   : > { %1405 = vmax.xlane.f32.xlu0 %v4161_v41 }
 0x27f   : > { %3530 = vmatpush3.bf16.msra.mxu1 %v3527_v8 }
 0x280   : > { %3339 = vmatprep.subr.bf16.mxu1 %v3645_v18 }
 0x2b4   : > { %v4212_v9 = vpop.f32.mrb[4].mxu0 }
 0x2b5   : > { %v4214_v11 = vpop.f32.mrb[20].mxu1  ;;  %v3155_v52 = vpop.f32.mrb[5].mxu0 }
 0x2b6   : > { %v4216_v12 = vpop.f32.mrb[6].mxu0  ;;  %1407 = vmax.xlane.f32.xlu1 %v4214_v11  ;;  %v3135_v15 = vpop.f32.mrb[21].mxu1  ;;  %v3630_v52 = vld [vmem:[%s4771_s5 + $0x8] sm:$0xff]  }
 0x2b7   : > { %v4219_v61 = vpop.f32.mrb[22].mxu1  ;;  %v3156_v17 = vpop.f32.mrb[7].mxu0 }
 0x2b8   : > { %1409 = vmax.xlane.f32.xlu0 %v4219_v61  ;;  %v3136_v19 = vpop.f32.mrb[23].mxu1 }
 0x2b9   : > { %v3632_v19 = vld [vmem:[%s4771_s5 + $0x20] sm:$0xff]  }
 0x2ba   : > { %1411 = vmax.xlane.f32.xlu1 %v4212_v9 }
 0x2bc   : > { %1413 = vmax.xlane.f32.xlu0 %v4216_v12 }
 0x2f4   : > { %v4224_v4 = vpop.f32.mrb[8].mxu0 }
 0x2f5   : > { %v4226_v20 = vpop.f32.mrb[24].mxu1  ;;  %v3195_v21 = vpop.f32.mrb[9].mxu0 }
 0x2f6   : > { %v4228_v22 = vpop.f32.mrb[10].mxu0  ;;  %1415 = vmax.xlane.f32.xlu1 %v4226_v20  ;;  %v3175_v23 = vpop.f32.mrb[25].mxu1  ;;  %v3633_v21 = vld [vmem:[%s4771_s5 + $0x28] sm:$0xff]  }
 0x2f7   : > { %v4231_v10 = vpop.f32.mrb[26].mxu1  ;;  %v3196_v24 = vpop.f32.mrb[11].mxu0 }
 0x2f8   : > { %1417 = vmax.xlane.f32.xlu0 %v4231_v10  ;;  %v3176_v25 = vpop.f32.mrb[27].mxu1 }
 0x2f9   : > { %v3634_v25 = vld [vmem:[%s4771_s5 + $0x30] sm:$0xff]  }
 0x2fa   : > { %1419 = vmax.xlane.f32.xlu1 %v4224_v4 }
 0x2fc   : > { %1421 = vmax.xlane.f32.xlu0 %v4228_v22 }
 0x303   : > { %v1400_v27 = vpop.xlane.xlu0 %1399 }
 0x304   : > { %v1431_v16 = vsub.f32 %v4153_v37, %v1400_v27  ;;  %v3635_v27 = vld [vmem:[%s4771_s5 + $0x38] sm:$0xff]  }
 0x305   : > { %v1402_v28 = vpop.xlane.xlu1 %1401 }
 0x306   : > { %v1447_v31 = vmul.f32 1.442695, %v1431_v16  ;;  %v1432_v32 = vsub.f32 %v4164_v47, %v1402_v28  ;;  %v1656_v16 = vld [vmem:[%s4773_s7] sm:$0xff] }
 0x307   : > { %v1404_v33 = vpop.xlane.xlu0 %1403  ;;  %3293 = vmatprep.subr.mxu0 %v1656_v16 }
 0x308   : > { %3564 = vpow2.f32 %v1447_v31  ;;  %v1449_v34 = vmul.f32 1.442695, %v1432_v32  ;;  %v1433_v38 = vsub.f32 %v4151_v35, %v1404_v33  ;;  %3294 = vmatpush3.msra.mxu0 %v1656_v16 }
 0x309   : > { %3319 = vmatprep.subr.bf16.mxu0 %v3645_v18 }
 0x30a   : > { %3566 = vpow2.f32 %v1449_v34  ;;  %v1451_v39 = vmul.f32 1.442695, %v1433_v38 }
 0x30b   : > { %v1406_v40 = vpop.xlane.xlu0 %1405 }
 0x30c   : > { %3568 = vpow2.f32 %v1451_v39  ;;  %v1434_v43 = vsub.f32 %v4161_v41, %v1406_v40 }
 0x30e   : > { %v1453_v44 = vmul.f32 1.442695, %v1434_v43 }
 0x310   : > { %3570 = vpow2.f32 %v1453_v44 }
 0x312   : > { %v4240_v48 = vpop.eup %3564 }
 0x313   : > { %3269 = vmatprep.mubr.f32.mxu1 %v4240_v48 }
 0x314   : > { %v4243_v37 = vpop.eup %3566 }
 0x315   : > { %3270 = vmatmul.mubr.f32.vlgmr.msra.gmra.mrb[32].mxu1 %v4243_v37  ;;  %v1939_v47 = vpack.c.bf16 %v4243_v37, %v4240_v48 }
 0x316   : > { %v4248_v35 = vpop.eup %3568 }
 0x317   : > { %3272 = vmatprep.mubr.f32.mxu1 %v4248_v35 }
 0x31a   : > { %v4251_v49 = vpop.eup %3570 }
 0x31b   : > { %3273 = vmatmul.mubr.f32.gmra.mrb[34].mxu1 %v4251_v49  ;;  %v1940_v41 = vpack.c.bf16 %v4251_v49, %v4248_v35 }
 0x334   : > { %v4256_v50 = vpop.f32.mrb[12].mxu0 }
 0x335   : > { %v4258_v51 = vpop.f32.mrb[28].mxu1  ;;  %v3235_v53 = vpop.f32.mrb[13].mxu0 }
 0x336   : > { %v4260_v54 = vpop.f32.mrb[14].mxu0  ;;  %1423 = vmax.xlane.f32.xlu1 %v4258_v51  ;;  %v3215_v55 = vpop.f32.mrb[29].mxu1 }
 0x337   : > { %v4263_v56 = vpop.f32.mrb[30].mxu1  ;;  %v3236_v57 = vpop.f32.mrb[15].mxu0 }
 0x338   : > { %1425 = vmax.xlane.f32.xlu0 %v4263_v56  ;;  %v3216_v58 = vpop.f32.mrb[31].mxu1 }
 0x33a   : > { %1427 = vmax.xlane.f32.xlu1 %v4256_v50 }
 0x33c   : > { %1429 = vmax.xlane.f32.xlu0 %v4260_v54 }
 0x343   : > { %v1408_v59 = vpop.xlane.xlu1 %1407 }
 0x344   : > { %v1435_v63 = vsub.f32 %v4214_v11, %v1408_v59  ;;  %v3629_v11 = vld [vmem:[%s4771_s5 + $0x10] sm:$0xff]  }
 0x345   : > { %v1410_v0 = vpop.xlane.xlu0 %1409 }
 0x346   : > { %v1455_v1 = vmul.f32 1.442695, %v1435_v63  ;;  %v1436_v2 = vsub.f32 %v4219_v61, %v1410_v0 }
 0x347   : > { %v1412_v3 = vpop.xlane.xlu1 %1411 }
 0x348   : > { %3572 = vpow2.f32 %v1455_v1  ;;  %v1457_v5 = vmul.f32 1.442695, %v1436_v2  ;;  %v1437_v26 = vsub.f32 %v4212_v9, %v1412_v3 }
 0x349   : > { %v1414_v6 = vpop.xlane.xlu0 %1413 }
 0x34a   : > { %3574 = vpow2.f32 %v1457_v5  ;;  %v1459_v36 = vmul.f32 1.442695, %v1437_v26  ;;  %v1438_v7 = vsub.f32 %v4216_v12, %v1414_v6  ;;  %v3631_v12 = vld [vmem:[%s4771_s5 + $0x18] sm:$0xff]  }
 0x34b   : > { %1851 = vrot.lane.b32.xlu1 %v3628_v42, %s3648_s10 }
 0x34c   : > { %3576 = vpow2.f32 %v1459_v36  ;;  %v1461_v8 = vmul.f32 1.442695, %v1438_v7 }
 0x34e   : > { %3578 = vpow2.f32 %v1461_v8 }
 0x34f   : > { %1855 = vrot.lane.b32.xlu1 %v3629_v11, %s3648_s10 }
 0x352   : > { %v4280_v9 = vpop.eup %3572  ;;  %1853 = vrot.lane.b32.xlu0 %v3630_v52, %s3648_s10 }
 0x353   : > { %3275 = vmatprep.mubr.f32.mxu1 %v4280_v9  ;;  %1857 = vrot.lane.b32.xlu1 %v3631_v12, %s3648_s10 }
 0x354   : > { %v4291_v15 = vpop.eup %3574 }
 0x355   : > { %3276 = vmatmul.mubr.f32.gmra.mrb[36].mxu1 %v4291_v15  ;;  %v1941_v61 = vpack.c.bf16 %v4291_v15, %v4280_v9 }
 0x356   : > { %v4296_v17 = vpop.eup %3576  ;;  %1859 = vrot.lane.b32.xlu0 %v3632_v19, %s3648_s10 }
 0x357   : > { %3278 = vmatprep.mubr.f32.mxu1 %v4296_v17  ;;  %1861 = vrot.lane.b32.xlu1 %v3633_v21, %s3648_s10 }
 0x358   : > { %v4307_v23 = vpop.eup %3578 }
 0x359   : > { %3279 = vmatmul.mubr.f32.gmra.mrb[38].mxu1 %v4307_v23  ;;  %v1942_v24 = vpack.c.bf16 %v4307_v23, %v4296_v17 }
 0x35a   : > { %1863 = vrot.lane.b32.xlu0 %v3634_v25, %s3648_s10 }
 0x35b   : > { %1865 = vrot.lane.b32.xlu1 %v3635_v27, %s3648_s10 }
 0x383   : > { %v1416_v28 = vpop.xlane.xlu1 %1415 }
 0x384   : > { %v1439_v31 = vsub.f32 %v4226_v20, %v1416_v28 }
 0x385   : > { %v1418_v32 = vpop.xlane.xlu0 %1417 }
 0x386   : > { %v1463_v33 = vmul.f32 1.442695, %v1439_v31  ;;  %v1440_v34 = vsub.f32 %v4231_v10, %v1418_v32 }
 0x387   : > { %v1420_v38 = vpop.xlane.xlu1 %1419 }
 0x388   : > { %3580 = vpow2.f32 %v1463_v33  ;;  %v1465_v39 = vmul.f32 1.442695, %v1440_v34  ;;  %v1441_v40 = vsub.f32 %v4224_v4, %v1420_v38 }
 0x389   : > { %v1422_v43 = vpop.xlane.xlu0 %1421 }
 0x38a   : > { %3582 = vpow2.f32 %v1465_v39  ;;  %v1467_v44 = vmul.f32 1.442695, %v1441_v40  ;;  %v1442_v53 = vsub.f32 %v4228_v22, %v1422_v43 }
 0x38c   : > { %3584 = vpow2.f32 %v1467_v44  ;;  %v1469_v55 = vmul.f32 1.442695, %v1442_v53 }
 0x38e   : > { %3586 = vpow2.f32 %v1469_v55 }
 0x392   : > { %v4328_v57 = vpop.eup %3580 }
 0x393   : > { %3281 = vmatprep.mubr.f32.mxu1 %v4328_v57 }
 0x394   : > { %v4331_v20 = vpop.eup %3582 }
 0x395   : > { %3282 = vmatmul.mubr.f32.gmra.mrb[40].mxu1 %v4331_v20  ;;  %v1943_v10 = vpack.c.bf16 %v4331_v20, %v4328_v57 }
 0x396   : > { %v4336_v4 = vpop.eup %3584 }
 0x397   : > { %3284 = vmatprep.mubr.f32.mxu1 %v4336_v4 }
 0x398   : > { %v4339_v58 = vpop.eup %3586 }
 0x399   : > { %3285 = vmatmul.mubr.f32.gmra.mrb[42].mxu1 %v4339_v58  ;;  %v1944_v22 = vpack.c.bf16 %v4339_v58, %v4336_v4 }
 0x3c3   : > { %v1424_v59 = vpop.xlane.xlu1 %1423 }
 0x3c4   : > { %v1443_v63 = vsub.f32 %v4258_v51, %v1424_v59 }
 0x3c5   : > { %v1426_v0 = vpop.xlane.xlu0 %1425 }
 0x3c6   : > { %v1471_v1 = vmul.f32 1.442695, %v1443_v63  ;;  %v1444_v2 = vsub.f32 %v4263_v56, %v1426_v0 }
 0x3c7   : > { %v1428_v3 = vpop.xlane.xlu1 %1427 }
 0x3c8   : > { %3588 = vpow2.f32 %v1471_v1  ;;  %v1473_v5 = vmul.f32 1.442695, %v1444_v2  ;;  %v1445_v26 = vsub.f32 %v4256_v50, %v1428_v3 }
 0x3c9   : > { %v1430_v6 = vpop.xlane.xlu0 %1429 }
 0x3ca   : > { %3590 = vpow2.f32 %v1473_v5  ;;  %v1475_v36 = vmul.f32 1.442695, %v1445_v26  ;;  %v1446_v7 = vsub.f32 %v4260_v54, %v1430_v6 }
 0x3cb   : > { %v4348_v42 = vpop.permute.xlu1 %1851 }
 0x3cc   : > { %3592 = vpow2.f32 %v1475_v36  ;;  %v1477_v8 = vmul.f32 1.442695, %v1446_v7  ;;  %v1883_v51 = vmul.bf16 %v4348_v42, %v3759_v29  ;;  %v1875_v56 = vmul.bf16 %v4348_v42, %v3761_v30 }
 0x3cd   : > { %v4354_v11 = vpop.permute.xlu0 %1853  ;;  %v1899_v26 = vmul.bf16 %v4348_v42, %v3781_v45  ;;  %v1891_v6 = vmul.bf16 %v4348_v42, %v3784_v46 }
 0x3ce   : > { %3594 = vpow2.f32 %v1477_v8  ;;  %2028 = vrot.lane.b32.xlu1 %v1883_v51, %s3648_s10  ;;  %1955 = vrot.lane.b32.xlu0 %v1875_v56, %s3648_s10  ;;  %v1884_v54 = vmul.bf16 %v4354_v11, %v3759_v29  ;;  %v1876_v52 = vmul.bf16 %v4354_v11, %v3761_v30  ;;  %v1892_v7 = vmul.bf16 %v4354_v11, %v3784_v46 }
 0x3cf   : > { %v4358_v50 = vpop.permute.xlu1 %1855 }
 0x3d0   : > { %v1885_v21 = vmul.bf16 %v4358_v50, %v3759_v29  ;;  %v1877_v25 = vmul.bf16 %v4358_v50, %v3761_v30  ;;  %v1901_v51 = vmul.bf16 %v4358_v50, %v3781_v45 }
 0x3d1   : > { %v4389_v33 = vpop.permute.xlu0 %1859 }
 0x3d2   : > { %v4364_v12 = vpop.eup %3588  ;;  %2030 = vrot.lane.b32.xlu1 %v1884_v54, %s3648_s10  ;;  %1957 = vrot.lane.b32.xlu0 %v1876_v52, %s3648_s10  ;;  %v1887_v39 = vmul.bf16 %v4389_v33, %v3759_v29  ;;  %v1879_v40 = vmul.bf16 %v4389_v33, %v3761_v30  ;;  %v1893_v54 = vmul.bf16 %v4358_v50, %v3784_v46 }
 0x3d3   : > { %3287 = vmatprep.mubr.f32.mxu1 %v4364_v12  ;;  %v4375_v27 = vpop.permute.xlu1 %1857 }
 0x3d4   : > { %v4369_v19 = vpop.eup %3590  ;;  %v1886_v31 = vmul.bf16 %v4375_v27, %v3759_v29  ;;  %v1878_v32 = vmul.bf16 %v4375_v27, %v3761_v30  ;;  %v1902_v52 = vmul.bf16 %v4375_v27, %v3781_v45 }
 0x3d5   : > { %3288 = vmatmul.mubr.f32.gmra.mrb[44].mxu1 %v4369_v19  ;;  %v1945_v38 = vpack.c.bf16 %v4369_v19, %v4364_v12  ;;  %v4412_v55 = vpop.permute.xlu0 %1863 }
 0x3d6   : > { %v4378_v16 = vpop.eup %3592  ;;  %2032 = vrot.lane.b32.xlu1 %v1885_v21, %s3648_s10  ;;  %1959 = vrot.lane.b32.xlu0 %v1877_v25, %s3648_s10  ;;  %v1889_v59 = vmul.bf16 %v4412_v55, %v3759_v29  ;;  %v1881_v63 = vmul.bf16 %v4412_v55, %v3761_v30  ;;  %v1894_v21 = vmul.bf16 %v4375_v27, %v3784_v46 }
 0x3d7   : > { %3290 = vmatprep.mubr.f32.mxu1 %v4378_v16  ;;  %v4404_v43 = vpop.permute.xlu1 %1861 }
 0x3d8   : > { %v4383_v28 = vpop.eup %3594  ;;  %v1888_v44 = vmul.bf16 %v4404_v43, %v3759_v29  ;;  %v1880_v53 = vmul.bf16 %v4404_v43, %v3761_v30 }
 0x3d9   : > { %3291 = vmatmul.mubr.f32.gmra.mrb[46].mxu1 %v4383_v28  ;;  %v1946_v34 = vpack.c.bf16 %v4383_v28, %v4378_v16 }
 0x3da   : > { %2034 = vrot.lane.b32.xlu1 %v1886_v31, %s3648_s10  ;;  %1961 = vrot.lane.b32.xlu0 %v1878_v32, %s3648_s10  ;;  %v1903_v32 = vmul.bf16 %v4389_v33, %v3781_v45 }
 0x3db   : > { %3355 = vmatprep.mubr.msk.bf16.mxu1 %vm3647_vm1, %v3645_v18  ;;  %v4420_v0 = vpop.permute.xlu1 %1865 }
 0x3dc   : > { %v1890_v2 = vmul.bf16 %v4420_v0, %v3759_v29  ;;  %v1882_v3 = vmul.bf16 %v4420_v0, %v3761_v30  ;;  %v1900_v30 = vmul.bf16 %v4354_v11, %v3781_v45 }
 0x3de   : > { %2036 = vrot.lane.b32.xlu1 %v1887_v39, %s3648_s10  ;;  %1963 = vrot.lane.b32.xlu0 %v1879_v40, %s3648_s10  ;;  %v1895_v39 = vmul.bf16 %v4389_v33, %v3784_v46  ;;  %v1904_v40 = vmul.bf16 %v4404_v43, %v3781_v45 }
 0x3e2   : > { %2038 = vrot.lane.b32.xlu1 %v1888_v44, %s3648_s10  ;;  %1965 = vrot.lane.b32.xlu0 %v1880_v53, %s3648_s10  ;;  %v1896_v44 = vmul.bf16 %v4404_v43, %v3784_v46  ;;  %v1905_v53 = vmul.bf16 %v4412_v55, %v3781_v45 }
 0x3e6   : > { %2040 = vrot.lane.b32.xlu1 %v1889_v59, %s3648_s10  ;;  %1967 = vrot.lane.b32.xlu0 %v1881_v63, %s3648_s10  ;;  %v1897_v59 = vmul.bf16 %v4412_v55, %v3784_v46  ;;  %v1906_v63 = vmul.bf16 %v4420_v0, %v3781_v45  ;;  %v1916_v45 = vmul.bf16 %v4354_v11, %v3803_v60 }
 0x3e8   : > { %v3271_v1 = vpop.f32.mrb[32].mxu1 }
 0x3e9   : > { %v1561_v5 = vpop.f32.mrb[33].mxu1 }
 0x3ea   : > { %3596 = vrcp.f32 %v1561_v5  ;;  %2042 = vrot.lane.b32.xlu1 %v1890_v2, %s3648_s10  ;;  %1969 = vrot.lane.b32.xlu0 %v1882_v3, %s3648_s10  ;;  %v1915_v2 = vmul.bf16 %v4348_v42, %v3803_v60  ;;  %v1907_v3 = vmul.bf16 %v4348_v42, %v3808_v62  ;;  %v1917_v5 = vmul.bf16 %v4358_v50, %v3803_v60 }
 0x3eb   : > { %3598 = vrcp.f32 %v3271_v1  ;;  %v1898_v1 = vmul.bf16 %v4420_v0, %v3784_v46  ;;  %v1908_v46 = vmul.bf16 %v4354_v11, %v3808_v62 }
 0x3ee   : > { %v3274_v36 = vpop.f32.mrb[34].mxu1  ;;  %2174 = vrot.lane.b32.xlu1 %v1899_v26, %s3648_s10  ;;  %2101 = vrot.lane.b32.xlu0 %v1891_v6, %s3648_s10  ;;  %v1909_v26 = vmul.bf16 %v4358_v50, %v3808_v62  ;;  %v1918_v6 = vmul.bf16 %v4375_v27, %v3803_v60 }
 0x3ef   : > { %v1571_v29 = vpop.f32.mrb[35].mxu1 }
 0x3f0   : > { %3600 = vrcp.f32 %v1571_v29  ;;  %v1919_v29 = vmul.bf16 %v4389_v33, %v3803_v60 }
 0x3f1   : > { %3602 = vrcp.f32 %v3274_v36  ;;  %v1910_v36 = vmul.bf16 %v4375_v27, %v3808_v62 }
 0x3f2   : > { %2176 = vrot.lane.b32.xlu1 %v1900_v30, %s3648_s10  ;;  %2103 = vrot.lane.b32.xlu0 %v1892_v7, %s3648_s10  ;;  %v1911_v30 = vmul.bf16 %v4389_v33, %v3808_v62  ;;  %v1920_v7 = vmul.bf16 %v4404_v43, %v3803_v60 }
 0x3f4   : > { %v3597_v8 = vpop.eup %3596 }
 0x3f5   : > { %v3599_v56 = vpop.eup %3598  ;;  %3295 = vmatprep.mubr.msk.f32.mxu0 %vm1657_vm2, %v3597_v8  ;;  %v1912_v8 = vmul.bf16 %v4404_v43, %v3808_v62 }
 0x3f6   : > { %3296 = vmatmul.mubr.msk.f32.vlgmr.msra.gmra.mrb[16].mxu0 %vm1657_vm2, %v3599_v56  ;;  %2178 = vrot.lane.b32.xlu1 %v1901_v51, %s3648_s10  ;;  %v1921_v51 = vmul.bf16 %v4412_v55, %v3803_v60  ;;  %v1913_v56 = vmul.bf16 %v4412_v55, %v3808_v62 }
 0x3f7   : > { %2105 = vrot.lane.b32.xlu0 %v1893_v54, %s3648_s10 }
 0x3fa   : > { %v3601_v25 = vpop.eup %3600  ;;  %2180 = vrot.lane.b32.xlu1 %v1902_v52, %s3648_s10  ;;  %v1922_v52 = vmul.bf16 %v4420_v0, %v3803_v60  ;;  %v1932_v60 = vmul.bf16 %v4354_v11, %v3829_v13 }
 0x3fb   : > { %v3603_v31 = vpop.eup %3602  ;;  %2107 = vrot.lane.b32.xlu0 %v1894_v21, %s3648_s10  ;;  %3298 = vmatprep.mubr.msk.f32.mxu0 %vm1657_vm2, %v3601_v25  ;;  %v1914_v25 = vmul.bf16 %v4420_v0, %v3808_v62  ;;  %v1924_v62 = vmul.bf16 %v4354_v11, %v3832_v14 }
 0x3fc   : > { %3299 = vmatmul.mubr.msk.f32.gmra.mrb[18].mxu0 %vm1657_vm2, %v3603_v31 }
 0x3fe   : > { %2182 = vrot.lane.b32.xlu1 %v1903_v32, %s3648_s10  ;;  %v1931_v32 = vmul.bf16 %v4348_v42, %v3829_v13 }
 0x3ff   : > { %2109 = vrot.lane.b32.xlu0 %v1895_v39, %s3648_s10 }
 0x402   : > { %2184 = vrot.lane.b32.xlu1 %v1904_v40, %s3648_s10  ;;  %v1923_v40 = vmul.bf16 %v4348_v42, %v3832_v14  ;;  %v1933_v42 = vmul.bf16 %v4358_v50, %v3829_v13 }
 0x403   : > { %2111 = vrot.lane.b32.xlu0 %v1896_v44, %s3648_s10 }
 0x406   : > { %2186 = vrot.lane.b32.xlu1 %v1905_v53, %s3648_s10 }
 0x407   : > { %2113 = vrot.lane.b32.xlu0 %v1897_v59, %s3648_s10  ;;  %v1925_v59 = vmul.bf16 %v4358_v50, %v3832_v14  ;;  %v1935_v50 = vmul.bf16 %v4389_v33, %v3829_v13 }
 0x40a   : > { %2188 = vrot.lane.b32.xlu1 %v1906_v63, %s3648_s10  ;;  %v1934_v63 = vmul.bf16 %v4375_v27, %v3829_v13 }
 0x40b   : > { %2115 = vrot.lane.b32.xlu0 %v1898_v1, %s3648_s10 }
 0x40e   : > { %2320 = vrot.lane.b32.xlu1 %v1915_v2, %s3648_s10  ;;  %v1926_v2 = vmul.bf16 %v4375_v27, %v3832_v14  ;;  %v1936_v27 = vmul.bf16 %v4404_v43, %v3829_v13 }
 0x40f   : > { %2247 = vrot.lane.b32.xlu0 %v1907_v3, %s3648_s10  ;;  %v1927_v3 = vmul.bf16 %v4389_v33, %v3832_v14 }
 0x412   : > { %2322 = vrot.lane.b32.xlu1 %v1916_v45, %s3648_s10 }
 0x413   : > { %2249 = vrot.lane.b32.xlu0 %v1908_v46, %s3648_s10 }
 0x416   : > { %2324 = vrot.lane.b32.xlu1 %v1917_v5, %s3648_s10  ;;  %v1928_v5 = vmul.bf16 %v4404_v43, %v3832_v14 }
 0x417   : > { %2251 = vrot.lane.b32.xlu0 %v1909_v26, %s3648_s10 }
 0x41a   : > { %2326 = vrot.lane.b32.xlu1 %v1918_v6, %s3648_s10  ;;  %v1937_v6 = vmul.bf16 %v4412_v55, %v3829_v13 }
 0x41b   : > { %2253 = vrot.lane.b32.xlu0 %v1910_v36, %s3648_s10  ;;  %v1929_v36 = vmul.bf16 %v4412_v55, %v3832_v14 }
 0x41e   : > { %2328 = vrot.lane.b32.xlu1 %v1919_v29, %s3648_s10 }
 0x41f   : > { %2255 = vrot.lane.b32.xlu0 %v1911_v30, %s3648_s10  ;;  %v1938_v30 = vmul.bf16 %v4420_v0, %v3829_v13 }
 0x422   : > { %2330 = vrot.lane.b32.xlu1 %v1920_v7, %s3648_s10  ;;  %v1930_v7 = vmul.bf16 %v4420_v0, %v3832_v14 }
 0x423   : > { %2257 = vrot.lane.b32.xlu0 %v1912_v8, %s3648_s10 }
 0x426   : > { %2332 = vrot.lane.b32.xlu1 %v1921_v51, %s3648_s10 }
 0x427   : > { %2259 = vrot.lane.b32.xlu0 %v1913_v56, %s3648_s10 }
 0x428   : > { %v3277_v54 = vpop.f32.mrb[36].mxu1 }
 0x429   : > { %v1581_v21 = vpop.f32.mrb[37].mxu1 }
 0x42a   : > { %3604 = vrcp.f32 %v1581_v21  ;;  %2334 = vrot.lane.b32.xlu1 %v1922_v52, %s3648_s10 }
 0x42b   : > { %3606 = vrcp.f32 %v3277_v54  ;;  %2261 = vrot.lane.b32.xlu0 %v1914_v25, %s3648_s10 }
 0x42c   : > { %v3280_v31 = vpop.f32.mrb[38].mxu1 }
 0x42d   : > { %v1591_v39 = vpop.f32.mrb[39].mxu1 }
 0x42e   : > { %3608 = vrcp.f32 %v1591_v39  ;;  %2466 = vrot.lane.b32.xlu1 %v1931_v32, %s3648_s10 }
 0x42f   : > { %3610 = vrcp.f32 %v3280_v31  ;;  %2393 = vrot.lane.b32.xlu0 %v1923_v40, %s3648_s10 }
 0x432   : > { %2468 = vrot.lane.b32.xlu1 %v1932_v60, %s3648_s10 }
 0x433   : > { %2395 = vrot.lane.b32.xlu0 %v1924_v62, %s3648_s10 }
 0x434   : > { %v3605_v44 = vpop.eup %3604 }
 0x435   : > { %v3607_v53 = vpop.eup %3606  ;;  %3301 = vmatprep.mubr.msk.f32.mxu0 %vm1657_vm2, %v3605_v44 }
 0x436   : > { %3302 = vmatmul.mubr.msk.f32.gmra.mrb[20].mxu0 %vm1657_vm2, %v3607_v53  ;;  %2470 = vrot.lane.b32.xlu1 %v1933_v42, %s3648_s10 }
 0x437   : > { %2397 = vrot.lane.b32.xlu0 %v1925_v59, %s3648_s10 }
 0x438   : > { %v3609_v11 = vpop.eup %3608 }
 0x439   : > { %v3611_v1 = vpop.eup %3610  ;;  %3304 = vmatprep.mubr.msk.f32.mxu0 %vm1657_vm2, %v3609_v11 }
 0x43a   : > { %3305 = vmatmul.mubr.msk.f32.gmra.mrb[22].mxu0 %vm1657_vm2, %v3611_v1  ;;  %2472 = vrot.lane.b32.xlu1 %v1934_v63, %s3648_s10 }
 0x43b   : > { %2399 = vrot.lane.b32.xlu0 %v1926_v2, %s3648_s10 }
 0x43e   : > { %2474 = vrot.lane.b32.xlu1 %v1935_v50, %s3648_s10 }
 0x43f   : > { %2401 = vrot.lane.b32.xlu0 %v1927_v3, %s3648_s10 }
 0x440   : > { %v2029_v45 = vpop.permute.xlu1 %2028  ;;  %v1956_v46 = vpop.permute.xlu0 %1955 }
 0x441   : > { %3320 = vmatpush3.bf16.msra.mxu0 %v1956_v46  ;;  %3340 = vmatpush3.bf16.msra.mxu1 %v2029_v45 }
 0x442   : > { %2476 = vrot.lane.b32.xlu1 %v1936_v27, %s3648_s10  ;;  %3341 = vmatprep.subr.bf16.mxu1 %v3645_v18 }
 0x443   : > { %2403 = vrot.lane.b32.xlu0 %v1928_v5, %s3648_s10  ;;  %3321 = vmatprep.subr.bf16.mxu0 %v3645_v18 }
 0x444   : > { %v2031_v33 = vpop.permute.xlu1 %2030  ;;  %v1958_v26 = vpop.permute.xlu0 %1957 }
 0x445   : > { %3322 = vmatpush3.bf16.msra.mxu0 %v1958_v26  ;;  %3342 = vmatpush3.bf16.msra.mxu1 %v2031_v33 }
 0x446   : > { %2478 = vrot.lane.b32.xlu1 %v1937_v6, %s3648_s10  ;;  %3343 = vmatprep.subr.bf16.mxu1 %v3645_v18 }
 0x447   : > { %2405 = vrot.lane.b32.xlu0 %v1929_v36, %s3648_s10  ;;  %3323 = vmatprep.subr.bf16.mxu0 %v3645_v18 }
 0x448   : > { %v2033_v43 = vpop.permute.xlu1 %2032  ;;  %v1960_v29 = vpop.permute.xlu0 %1959 }
 0x449   : > { %3324 = vmatpush3.bf16.msra.mxu0 %v1960_v29  ;;  %3344 = vmatpush3.bf16.msra.mxu1 %v2033_v43 }
 0x44a   : > { %2480 = vrot.lane.b32.xlu1 %v1938_v30, %s3648_s10  ;;  %3345 = vmatprep.subr.bf16.mxu1 %v3645_v18 }
 0x44b   : > { %2407 = vrot.lane.b32.xlu0 %v1930_v7, %s3648_s10  ;;  %3325 = vmatprep.subr.bf16.mxu0 %v3645_v18 }
 0x44c   : > { %v2035_v55 = vpop.permute.xlu1 %2034  ;;  %v1962_v8 = vpop.permute.xlu0 %1961 }
 0x44d   : > { %3326 = vmatpush3.bf16.msra.mxu0 %v1962_v8  ;;  %3346 = vmatpush3.bf16.msra.mxu1 %v2035_v55 }
 0x44e   : > { %3347 = vmatprep.subr.bf16.mxu1 %v3645_v18  ;;  %3327 = vmatprep.subr.bf16.mxu0 %v3645_v18 }
 0x450   : > { %v2037_v13 = vpop.permute.xlu1 %2036  ;;  %v1964_v51 = vpop.permute.xlu0 %1963 }
 0x451   : > { %3328 = vmatpush3.bf16.msra.mxu0 %v1964_v51  ;;  %3348 = vmatpush3.bf16.msra.mxu1 %v2037_v13 }
 0x452   : > { %3349 = vmatprep.subr.bf16.mxu1 %v3645_v18  ;;  %3329 = vmatprep.subr.bf16.mxu0 %v3645_v18 }
 0x454   : > { %v2039_v14 = vpop.permute.xlu1 %2038  ;;  %v1966_v0 = vpop.permute.xlu0 %1965 }
 0x455   : > { %3330 = vmatpush3.bf16.msra.mxu0 %v1966_v0  ;;  %3350 = vmatpush3.bf16.msra.mxu1 %v2039_v14 }
 0x456   : > { %3351 = vmatprep.subr.bf16.mxu1 %v3645_v18  ;;  %3331 = vmatprep.subr.bf16.mxu0 %v3645_v18 }
 0x458   : > { %v2041_v56 = vpop.permute.xlu1 %2040  ;;  %v1968_v54 = vpop.permute.xlu0 %1967 }
 0x459   : > { %3332 = vmatpush3.bf16.msra.mxu0 %v1968_v54  ;;  %3352 = vmatpush3.bf16.msra.mxu1 %v2041_v56 }
 0x45a   : > { %3353 = vmatprep.subr.bf16.mxu1 %v3645_v18  ;;  %3333 = vmatprep.subr.bf16.mxu0 %v3645_v18 }
 0x45c   : > { %v2043_v52 = vpop.permute.xlu1 %2042  ;;  %v1970_v21 = vpop.permute.xlu0 %1969 }
 0x45d   : > { %3334 = vmatpush3.bf16.msra.mxu0 %v1970_v21  ;;  %3354 = vmatpush3.bf16.msra.mxu1 %v2043_v52 }
 0x45e   : > { %3379 = vmatprep.subr.bf16.mxu1 %v3645_v18  ;;  %3359 = vmatprep.subr.bf16.mxu0 %v3645_v18 }
 0x460   : > { %3356 = vmatmul.mubr.bf16.vlgmr.msra.gmra.mrb[48].mxu1 %v1940_v41  ;;  %v2175_v25 = vpop.permute.xlu1 %2174  ;;  %v2102_v17 = vpop.permute.xlu0 %2101 }
 0x461   : > { %3380 = vmatpush3.bf16.msra.mxu1 %v2175_v25  ;;  %3395 = vmatprep.mubr.msk.bf16.mxu1 %vm3647_vm1, %v3645_v18 }
 0x462   : > { %3381 = vmatprep.subr.bf16.mxu1 %v3645_v18 }
 0x464   : > { %v2177_v31 = vpop.permute.xlu1 %2176  ;;  %v2104_v45 = vpop.permute.xlu0 %2103 }
 0x465   : > { %3382 = vmatpush3.bf16.msra.mxu1 %v2177_v31 }
 0x466   : > { %3383 = vmatprep.subr.bf16.mxu1 %v3645_v18 }
 0x468   : > { %v3283_v32 = vpop.f32.mrb[40].mxu1  ;;  %v2179_v39 = vpop.permute.xlu1 %2178 }
 0x469   : > { %v1601_v40 = vpop.f32.mrb[41].mxu1  ;;  %3384 = vmatpush3.bf16.msra.mxu1 %v2179_v39  ;;  %v2106_v27 = vpop.permute.xlu0 %2105 }
 0x46a   : > { %3612 = vrcp.f32 %v1601_v40  ;;  %3385 = vmatprep.subr.bf16.mxu1 %v3645_v18 }
 0x46b   : > { %3614 = vrcp.f32 %v3283_v32 }
 0x46c   : > { %v3286_v35 = vpop.f32.mrb[42].mxu1  ;;  %v2181_v49 = vpop.permute.xlu1 %2180 }
 0x46d   : > { %v1611_v41 = vpop.f32.mrb[43].mxu1  ;;  %3386 = vmatpush3.bf16.msra.mxu1 %v2181_v49  ;;  %v2108_v26 = vpop.permute.xlu0 %2107 }
 0x46e   : > { %3616 = vrcp.f32 %v1611_v41  ;;  %3387 = vmatprep.subr.bf16.mxu1 %v3645_v18 }
 0x46f   : > { %3618 = vrcp.f32 %v3286_v35 }
 0x470   : > { %v2183_v60 = vpop.permute.xlu1 %2182 }
 0x471   : > { %3388 = vmatpush3.bf16.msra.mxu1 %v2183_v60  ;;  %v2110_v36 = vpop.permute.xlu0 %2109 }
 0x472   : > { %3389 = vmatprep.subr.bf16.mxu1 %v3645_v18 }
 0x474   : > { %v3613_v62 = vpop.eup %3612  ;;  %v2185_v44 = vpop.permute.xlu1 %2184 }
 0x475   : > { %v3615_v42 = vpop.eup %3614  ;;  %3307 = vmatprep.mubr.msk.f32.mxu0 %vm1657_vm2, %v3613_v62  ;;  %3390 = vmatpush3.bf16.msra.mxu1 %v2185_v44  ;;  %v2112_v7 = vpop.permute.xlu0 %2111 }
 0x476   : > { %3308 = vmatmul.mubr.msk.f32.gmra.mrb[24].mxu0 %vm1657_vm2, %v3615_v42  ;;  %3391 = vmatprep.subr.bf16.mxu1 %v3645_v18  ;;  %v3562_v42 = vld [vmem:[%s4769_s3] sm:$0xff]  }
 0x478   : > { %v3617_v53 = vpop.eup %3616  ;;  %v2187_v59 = vpop.permute.xlu1 %2186 }
 0x479   : > { %v3619_v11 = vpop.eup %3618  ;;  %3310 = vmatprep.mubr.msk.f32.mxu0 %vm1657_vm2, %v3617_v53  ;;  %3392 = vmatpush3.bf16.msra.mxu1 %v2187_v59  ;;  %v2114_v13 = vpop.permute.xlu0 %2113  ;;  %v3563_v59 = vld [vmem:[%s4769_s3 + $0x8] sm:$0xff]  }
 0x47a   : > { %3311 = vmatmul.mubr.msk.f32.gmra.mrb[26].mxu0 %vm1657_vm2, %v3619_v11  ;;  %3393 = vmatprep.subr.bf16.mxu1 %v3645_v18 }
 0x47c   : > { %v2189_v63 = vpop.permute.xlu1 %2188 }
 0x47d   : > { %3394 = vmatpush3.bf16.msra.mxu1 %v2189_v63  ;;  %v2116_v52 = vpop.permute.xlu0 %2115 }
 0x47e   : > { %3419 = vmatprep.subr.bf16.mxu1 %v3645_v18 }
 0x480   : > { %3396 = vmatmul.mubr.bf16.vlgmr.msra.gmra.mrb[52].mxu1 %v1942_v24  ;;  %v2321_v1 = vpop.permute.xlu1 %2320 }
 0x481   : > { %3420 = vmatpush3.bf16.msra.mxu1 %v2321_v1  ;;  %3435 = vmatprep.mubr.msk.bf16.mxu1 %vm3647_vm1, %v3645_v18  ;;  %v2248_v25 = vpop.permute.xlu0 %2247 }
 0x482   : > { %3421 = vmatprep.subr.bf16.mxu1 %v3645_v18 }
 0x484   : > { %v2323_v2 = vpop.permute.xlu1 %2322 }
 0x485   : > { %3422 = vmatpush3.bf16.msra.mxu1 %v2323_v2  ;;  %v2250_v31 = vpop.permute.xlu0 %2249 }
 0x486   : > { %3423 = vmatprep.subr.bf16.mxu1 %v3645_v18 }
 0x488   : > { %v2325_v50 = vpop.permute.xlu1 %2324 }
 0x489   : > { %3424 = vmatpush3.bf16.msra.mxu1 %v2325_v50 }
 0x48a   : > { %3425 = vmatprep.subr.bf16.mxu1 %v3645_v18 }
 0x48c   : > { %v2327_v3 = vpop.permute.xlu1 %2326 }
 0x48d   : > { %3426 = vmatpush3.bf16.msra.mxu1 %v2327_v3 }
 0x48e   : > { %3427 = vmatprep.subr.bf16.mxu1 %v3645_v18 }
 0x490   : > { %v2329_v23 = vpop.permute.xlu1 %2328 }
 0x491   : > { %3428 = vmatpush3.bf16.msra.mxu1 %v2329_v23 }
 0x492   : > { %3429 = vmatprep.subr.bf16.mxu1 %v3645_v18 }
 0x494   : > { %v2331_v24 = vpop.permute.xlu1 %2330 }
 0x495   : > { %3430 = vmatpush3.bf16.msra.mxu1 %v2331_v24 }
 0x496   : > { %3431 = vmatprep.subr.bf16.mxu1 %v3645_v18 }
 0x498   : > { %v2333_v46 = vpop.permute.xlu1 %2332 }
 0x499   : > { %3432 = vmatpush3.bf16.msra.mxu1 %v2333_v46 }
 0x49a   : > { %3433 = vmatprep.subr.bf16.mxu1 %v3645_v18 }
 0x49c   : > { %v2335_v5 = vpop.permute.xlu1 %2334 }
 0x49d   : > { %3434 = vmatpush3.bf16.msra.mxu1 %v2335_v5 }
 0x49e   : > { %3459 = vmatprep.subr.bf16.mxu1 %v3645_v18 }
 0x4a0   : > { %3436 = vmatmul.mubr.bf16.vlgmr.msra.gmra.mrb[56].mxu1 %v1944_v22  ;;  %v2467_v33 = vpop.permute.xlu1 %2466 }
 0x4a1   : > { %3460 = vmatpush3.bf16.msra.mxu1 %v2467_v33  ;;  %3475 = vmatprep.mubr.msk.bf16.mxu1 %vm3647_vm1, %v3645_v18 }
 0x4a2   : > { %3461 = vmatprep.subr.bf16.mxu1 %v3645_v18 }
 0x4a4   : > { %v2469_v6 = vpop.permute.xlu1 %2468 }
 0x4a5   : > { %3462 = vmatpush3.bf16.msra.mxu1 %v2469_v6 }
 0x4a6   : > { %3463 = vmatprep.subr.bf16.mxu1 %v3645_v18 }
 0x4a8   : > { %v3289_v43 = vpop.f32.mrb[44].mxu1  ;;  %v2471_v29 = vpop.permute.xlu1 %2470 }
 0x4a9   : > { %v1621_v30 = vpop.f32.mrb[45].mxu1  ;;  %3464 = vmatpush3.bf16.msra.mxu1 %v2471_v29 }
 0x4aa   : > { %3620 = vrcp.f32 %v1621_v30  ;;  %3465 = vmatprep.subr.bf16.mxu1 %v3645_v18 }
 0x4ab   : > { %3622 = vrcp.f32 %v3289_v43 }
 0x4ac   : > { %v3292_v4 = vpop.f32.mrb[46].mxu1  ;;  %v2473_v58 = vpop.permute.xlu1 %2472 }
 0x4ad   : > { %v1631_v22 = vpop.f32.mrb[47].mxu1  ;;  %3466 = vmatpush3.bf16.msra.mxu1 %v2473_v58 }
 0x4ae   : > { %3624 = vrcp.f32 %v1631_v22  ;;  %3467 = vmatprep.subr.bf16.mxu1 %v3645_v18 }
 0x4af   : > { %3626 = vrcp.f32 %v3292_v4 }
 0x4b0   : > { %v2475_v55 = vpop.permute.xlu1 %2474 }
 0x4b1   : > { %3468 = vmatpush3.bf16.msra.mxu1 %v2475_v55 }
 0x4b2   : > { %3469 = vmatprep.subr.bf16.mxu1 %v3645_v18 }
 0x4b4   : > { %v3621_v8 = vpop.eup %3620  ;;  %v2477_v51 = vpop.permute.xlu1 %2476 }
 0x4b5   : > { %v3623_v14 = vpop.eup %3622  ;;  %3313 = vmatprep.mubr.msk.f32.mxu0 %vm1657_vm2, %v3621_v8  ;;  %3470 = vmatpush3.bf16.msra.mxu1 %v2477_v51 }
 0x4b6   : > { %3314 = vmatmul.mubr.msk.f32.gmra.mrb[28].mxu0 %vm1657_vm2, %v3623_v14  ;;  %3471 = vmatprep.subr.bf16.mxu1 %v3645_v18 }
 0x4b8   : > { %v3625_v0 = vpop.eup %3624  ;;  %v2479_v56 = vpop.permute.xlu1 %2478 }
 0x4b9   : > { %v3627_v54 = vpop.eup %3626  ;;  %3316 = vmatprep.mubr.msk.f32.mxu0 %vm1657_vm2, %v3625_v0  ;;  %3472 = vmatpush3.bf16.msra.mxu1 %v2479_v56 }
 0x4ba   : > { %3317 = vmatmul.mubr.msk.f32.gmra.mrb[30].mxu0 %vm1657_vm2, %v3627_v54  ;;  %3473 = vmatprep.subr.bf16.mxu1 %v3645_v18 }
 0x4bb   : > { %3335 = vmatprep.mubr.msk.bf16.mxu0 %vm3647_vm1, %v3645_v18 }
 0x4bc   : > { %v2481_v21 = vpop.permute.xlu1 %2480 }
 0x4bd   : > { %3474 = vmatpush3.bf16.msra.mxu1 %v2481_v21 }
 0x4be   : > { %3336 = vmatmul.mubr.bf16.vlgmr.msra.gmra.mrb[32].mxu0 %v1939_v47  ;;  %v2252_v47 = vpop.permute.xlu0 %2251 }
 0x4bf   : > { %3360 = vmatpush3.bf16.msra.mxu0 %v2102_v17  ;;  %3375 = vmatprep.mubr.msk.bf16.mxu0 %vm3647_vm1, %v3645_v18 }
 0x4c0   : > { %3476 = vmatmul.mubr.bf16.vlgmr.msra.gmra.mrb[60].mxu1 %v1946_v34  ;;  %3361 = vmatprep.subr.bf16.mxu0 %v3645_v18 }
 0x4c2   : > { %v2254_v34 = vpop.permute.xlu0 %2253 }
 0x4c3   : > { %3362 = vmatpush3.bf16.msra.mxu0 %v2104_v45 }
 0x4c4   : > { %3363 = vmatprep.subr.bf16.mxu0 %v3645_v18 }
 0x4c6   : > { %v2256_v32 = vpop.permute.xlu0 %2255 }
 0x4c7   : > { %3364 = vmatpush3.bf16.msra.mxu0 %v2106_v27 }
 0x4c8   : > { %3365 = vmatprep.subr.bf16.mxu0 %v3645_v18 }
 0x4c9   : > { %v4657_v48 = vpop.f32.mrb[16].mxu0 }
 0x4ca   : > { %v4659_v37 = vpop.f32.mrb[17].mxu0  ;;  %v2258_v39 = vpop.permute.xlu0 %2257 }
 0x4cb   : > { %3366 = vmatpush3.bf16.msra.mxu0 %v2108_v26 }
 0x4cc   : > { %3367 = vmatprep.subr.bf16.mxu0 %v3645_v18 }
 0x4ce   : > { %v2260_v40 = vpop.permute.xlu0 %2259 }
 0x4cf   : > { %3368 = vmatpush3.bf16.msra.mxu0 %v2110_v36  ;;  %v4662_v16 = vpop.f32.mrb[18].mxu0 }
 0x4d0   : > { %v4664_v28 = vpop.f32.mrb[19].mxu0  ;;  %3369 = vmatprep.subr.bf16.mxu0 %v3645_v18 }
 0x4d2   : > { %v2262_v35 = vpop.permute.xlu0 %2261 }
 0x4d3   : > { %3370 = vmatpush3.bf16.msra.mxu0 %v2112_v7 }
 0x4d4   : > { %3371 = vmatprep.subr.bf16.mxu0 %v3645_v18 }
 0x4d6   : > { %v2394_v9 = vpop.permute.xlu0 %2393 }
 0x4d7   : > { %3372 = vmatpush3.bf16.msra.mxu0 %v2114_v13 }
 0x4d8   : > { %3373 = vmatprep.subr.bf16.mxu0 %v3645_v18 }
 0x4da   : > { %v2396_v15 = vpop.permute.xlu0 %2395 }
 0x4db   : > { %3374 = vmatpush3.bf16.msra.mxu0 %v2116_v52 }
 0x4dc   : > { %3399 = vmatprep.subr.bf16.mxu0 %v3645_v18 }
 0x4de   : > { %3376 = vmatmul.mubr.bf16.vlgmr.msra.gmra.mrb[36].mxu0 %v1941_v61  ;;  %v2398_v61 = vpop.permute.xlu0 %2397 }
 0x4df   : > { %3400 = vmatpush3.bf16.msra.mxu0 %v2248_v25  ;;  %3415 = vmatprep.mubr.msk.bf16.mxu0 %vm3647_vm1, %v3645_v18 }
 0x4e0   : > { %3401 = vmatprep.subr.bf16.mxu0 %v3645_v18 }
 0x4e2   : > { %v2400_v49 = vpop.permute.xlu0 %2399 }
 0x4e3   : > { %3402 = vmatpush3.bf16.msra.mxu0 %v2250_v31 }
 0x4e4   : > { %3403 = vmatprep.subr.bf16.mxu0 %v3645_v18 }
 0x4e6   : > { %v2402_v41 = vpop.permute.xlu0 %2401 }
 0x4e7   : > { %3404 = vmatpush3.bf16.msra.mxu0 %v2252_v47 }
 0x4e8   : > { %3405 = vmatprep.subr.bf16.mxu0 %v3645_v18 }
 0x4ea   : > { %v2404_v20 = vpop.permute.xlu0 %2403 }
 0x4eb   : > { %3406 = vmatpush3.bf16.msra.mxu0 %v2254_v34 }
 0x4ec   : > { %3407 = vmatprep.subr.bf16.mxu0 %v3645_v18 }
 0x4ee   : > { %v2406_v44 = vpop.permute.xlu0 %2405 }
 0x4ef   : > { %3408 = vmatpush3.bf16.msra.mxu0 %v2256_v32 }
 0x4f0   : > { %3409 = vmatprep.subr.bf16.mxu0 %v3645_v18 }
 0x4f2   : > { %v2408_v53 = vpop.permute.xlu0 %2407 }
 0x4f3   : > { %3410 = vmatpush3.bf16.msra.mxu0 %v2258_v39 }
 0x4f4   : > { %3411 = vmatprep.subr.bf16.mxu0 %v3645_v18 }
 0x4f7   : > { %3412 = vmatpush3.bf16.msra.mxu0 %v2260_v40 }
 0x4f8   : > { %3413 = vmatprep.subr.bf16.mxu0 %v3645_v18 }
 0x4fb   : > { %3414 = vmatpush3.bf16.msra.mxu0 %v2262_v35 }
 0x4fc   : > { %3439 = vmatprep.subr.bf16.mxu0 %v3645_v18 }
 0x4fe   : > { %3416 = vmatmul.mubr.bf16.vlgmr.msra.gmra.mrb[40].mxu0 %v1943_v10 }
 0x4ff   : > { %3440 = vmatpush3.bf16.msra.mxu0 %v2394_v9  ;;  %3455 = vmatprep.mubr.msk.bf16.mxu0 %vm3647_vm1, %v3645_v18 }
 0x500   : > { %3441 = vmatprep.subr.bf16.mxu0 %v3645_v18 }
 0x503   : > { %3442 = vmatpush3.bf16.msra.mxu0 %v2396_v15 }
 0x504   : > { %3443 = vmatprep.subr.bf16.mxu0 %v3645_v18 }
 0x507   : > { %3444 = vmatpush3.bf16.msra.mxu0 %v2398_v61 }
 0x508   : > { %3445 = vmatprep.subr.bf16.mxu0 %v3645_v18 }
 0x509   : > { %v4691_v60 = vpop.f32.mrb[20].mxu0 }
 0x50a   : > { %v4693_v62 = vpop.f32.mrb[21].mxu0 }
 0x50b   : > { %3446 = vmatpush3.bf16.msra.mxu0 %v2400_v49 }
 0x50c   : > { %3447 = vmatprep.subr.bf16.mxu0 %v3645_v18 }
 0x50d   : > { %v3306_v57 = vpop.f32.mrb[22].mxu0 }
 0x50e   : > { %v1802_v10 = vpop.f32.mrb[23].mxu0 }
 0x50f   : > { %3448 = vmatpush3.bf16.msra.mxu0 %v2402_v41 }
 0x510   : > { %3449 = vmatprep.subr.bf16.mxu0 %v3645_v18 }
 0x513   : > { %3450 = vmatpush3.bf16.msra.mxu0 %v2404_v20 }
 0x514   : > { %3451 = vmatprep.subr.bf16.mxu0 %v3645_v18 }
 0x517   : > { %3452 = vmatpush3.bf16.msra.mxu0 %v2406_v44 }
 0x518   : > { %3453 = vmatprep.subr.bf16.mxu0 %v3645_v18 }
 0x51b   : > { %3454 = vmatpush3.bf16.msra.mxu0 %v2408_v53 }
 0x51c   : > { %3479 = vmatprep.subr.bf16.mxu0 %v3562_v42 }
 0x51e   : > { %3456 = vmatmul.mubr.bf16.vlgmr.msra.gmra.mrb[44].mxu0 %v1945_v38 }
 0x51f   : > { %3480 = vmatpush3.bf16.msra.mxu0 %v3562_v42 }
 0x520   : > { %3481 = vmatprep.subr.bf16.mxu0 %v3563_v59 }
 0x523   : > { %3482 = vmatpush3.bf16.msra.mxu0 %v3563_v59 }
 0x533   : > { %v2086_v11 = vpop.f32.mrb[48].mxu1 }
 0x534   : > { %v2533_v18 = vmul.f32 %v2086_v11, %v4664_v28  ;;  %v3357_v63 = vpop.f32.mrb[49].mxu1  ;;  %v2831_v11 = vld [vmem:[%s4770_s4] ss:$0 sm:$0xff] }
 0x535   : > { %v2089_v1 = vpop.f32.mrb[50].mxu1 }
 0x536   : > { %v2534_v2 = vmul.f32 %v4662_v16, %v2089_v1  ;;  %v3358_v50 = vpop.f32.mrb[51].mxu1 }
 0x538   : > { %v2548_v3 = vpack.c.bf16 %v2534_v2, %v2533_v18 }
 0x549   : > { %v3309_v17 = vpop.f32.mrb[24].mxu0 }
 0x54a   : > { %v1812_v23 = vpop.f32.mrb[25].mxu0 }
 0x54d   : > { %v3312_v24 = vpop.f32.mrb[26].mxu0 }
 0x54e   : > { %v1822_v45 = vpop.f32.mrb[27].mxu0 }
 0x553   : > { %v2232_v46 = vpop.f32.mrb[52].mxu1 }
 0x554   : > { %v2537_v27 = vmul.f32 %v2232_v46, %v1802_v10  ;;  %v3397_v12 = vpop.f32.mrb[53].mxu1 }
 0x555   : > { %v2235_v19 = vpop.f32.mrb[54].mxu1 }
 0x556   : > { %v2538_v38 = vmul.f32 %v3306_v57, %v2235_v19  ;;  %v3398_v5 = vpop.f32.mrb[55].mxu1 }
 0x558   : > { %v2550_v33 = vpack.c.bf16 %v2538_v38, %v2537_v27 }
 0x573   : > { %v2378_v26 = vpop.f32.mrb[56].mxu1 }
 0x574   : > { %v2541_v6 = vmul.f32 %v2378_v26, %v1822_v45  ;;  %v3437_v36 = vpop.f32.mrb[57].mxu1 }
 0x575   : > { %v2381_v43 = vpop.f32.mrb[58].mxu1 }
 0x576   : > { %v2542_v29 = vmul.f32 %v3312_v24, %v2381_v43  ;;  %v3438_v30 = vpop.f32.mrb[59].mxu1 }
 0x578   : > { %v2552_v4 = vpack.c.bf16 %v2542_v29, %v2541_v6 }
 0x589   : > { %v3315_v58 = vpop.f32.mrb[28].mxu0 }
 0x58a   : > { %v1832_v22 = vpop.f32.mrb[29].mxu0 }
 0x58d   : > { %v3318_v7 = vpop.f32.mrb[30].mxu0 }
 0x58e   : > { %v1842_v55 = vpop.f32.mrb[31].mxu0 }
 0x591   : > { %v2013_v8 = vpop.f32.mrb[32].mxu0 }
 0x592   : > { %v2531_v13 = vmul.f32 %v2013_v8, %v4659_v37  ;;  %v3337_v51 = vpop.f32.mrb[33].mxu0 }
 0x593   : > { %v2016_v14 = vpop.f32.mrb[34].mxu0  ;;  %v2524_v0 = vpop.f32.mrb[60].mxu1 }
 0x594   : > { %v2532_v56 = vmul.f32 %v4657_v48, %v2016_v14  ;;  %v2545_v54 = vmul.f32 %v2524_v0, %v1842_v55  ;;  %v3338_v52 = vpop.f32.mrb[35].mxu0  ;;  %v3477_v21 = vpop.f32.mrb[61].mxu1 }
 0x595   : > { %v2527_v25 = vpop.f32.mrb[62].mxu1 }
 0x596   : > { %v2547_v31 = vpack.c.bf16 %v2532_v56, %v2531_v13  ;;  %v2546_v47 = vmul.f32 %v3318_v7, %v2527_v25  ;;  %v3478_v16 = vpop.f32.mrb[63].mxu1 }
 0x598   : > { %v2554_v28 = vpack.c.bf16 %v2546_v47, %v2545_v54  ;;  %3483 = vmatprep.mubr.msk.bf16.mxu0 %vm389_vm0, %v2547_v31 }
 0x599   : > { %3484 = vmatmul.mubr.msk.bf16.vlgmr.msra.gmra.mrb[48].mxu0 %vm389_vm0, %v2548_v3 }
 0x5b1   : > { %v2159_v34 = vpop.f32.mrb[36].mxu0 }
 0x5b2   : > { %v2535_v37 = vmul.f32 %v2159_v34, %v4693_v62  ;;  %v3377_v32 = vpop.f32.mrb[37].mxu0 }
 0x5b3   : > { %v2162_v39 = vpop.f32.mrb[38].mxu0 }
 0x5b4   : > { %v2536_v40 = vmul.f32 %v4691_v60, %v2162_v39  ;;  %v3378_v48 = vpop.f32.mrb[39].mxu0 }
 0x5b6   : > { %v2549_v35 = vpack.c.bf16 %v2536_v40, %v2535_v37 }
 0x5b8   : > { %3487 = vmatprep.mubr.msk.bf16.mxu0 %vm389_vm0, %v2549_v35 }
 0x5b9   : > { %3488 = vmatmul.mubr.msk.bf16.gmra.mrb[52].mxu0 %vm389_vm0, %v2550_v33 }
 0x5d1   : > { %v2305_v9 = vpop.f32.mrb[40].mxu0 }
 0x5d2   : > { %v2539_v15 = vmul.f32 %v2305_v9, %v1812_v23  ;;  %v3417_v61 = vpop.f32.mrb[41].mxu0 }
 0x5d3   : > { %v2308_v49 = vpop.f32.mrb[42].mxu0 }
 0x5d4   : > { %v2540_v41 = vmul.f32 %v3309_v17, %v2308_v49  ;;  %v3418_v57 = vpop.f32.mrb[43].mxu0 }
 0x5d6   : > { %v2551_v20 = vpack.c.bf16 %v2540_v41, %v2539_v15 }
 0x5d8   : > { %3491 = vmatprep.mubr.msk.bf16.mxu0 %vm389_vm0, %v2551_v20 }
 0x5d9   : > { %3492 = vmatmul.mubr.msk.bf16.gmra.mrb[56].mxu0 %vm389_vm0, %v2552_v4 }
 0x5f1   : > { %v2451_v62 = vpop.f32.mrb[44].mxu0 }
 0x5f2   : > { %v2543_v60 = vmul.f32 %v2451_v62, %v1832_v22  ;;  %v3457_v10 = vpop.f32.mrb[45].mxu0 }
 0x5f3   : > { %v2454_v44 = vpop.f32.mrb[46].mxu0 }
 0x5f4   : > { %v2544_v42 = vmul.f32 %v3315_v58, %v2454_v44  ;;  %v3458_v53 = vpop.f32.mrb[47].mxu0 }
 0x5f6   : > { %v2553_v59 = vpack.c.bf16 %v2544_v42, %v2543_v60 }
 0x5f8   : > { %3495 = vmatprep.mubr.msk.bf16.mxu0 %vm389_vm0, %v2553_v59 }
 0x5f9   : > { %3496 = vmatmul.mubr.msk.bf16.gmra.mrb[60].mxu0 %vm389_vm0, %v2554_v28 }
 0x66c   : > { %v3485_v18 = vpop.f32.mrb[48].mxu0 }
 0x66d   : > { %v2645_v63 = vadd.f32 %v3485_v18, %v2831_v11  ;;  %v2636_v1 = vpop.f32.mrb[49].mxu0 }
 0x66e   : > { %v2637_v2 = vadd.f32 %v2831_v11, %v2636_v1  ;;  %v3486_v50 = vpop.f32.mrb[50].mxu0 }
 0x66f   : > { %2701 = vst.msk [vmem:[%s4729_s16 + $0x10] sm:$0xff] %vm389_vm0, %v2645_v63  ;;  %v2648_v3 = vadd.f32 %v3486_v50, %v2831_v11  ;;  %v2639_v17 = vpop.f32.mrb[51].mxu0 }
 0x670   : > { %2699 = vst.msk [vmem:[%s4729_s16] sm:$0xff] %vm389_vm0, %v2637_v2  ;;  %v2640_v23 = vadd.f32 %v2831_v11, %v2639_v17 }
 0x671   : > { %2702 = vst.msk [vmem:[%s4729_s16 + $0x18] sm:$0xff] %vm389_vm0, %v2648_v3 }
 0x672   : > { %2700 = vst.msk [vmem:[%s4729_s16 + $0x8] sm:$0xff] %vm389_vm0, %v2640_v23 }
 0x68c   : > { %v3489_v24 = vpop.f32.mrb[52].mxu0 }
 0x68d   : > { %v2661_v45 = vadd.f32 %v3489_v24, %v2831_v11  ;;  %v2652_v46 = vpop.f32.mrb[53].mxu0 }
 0x68e   : > { %v2653_v27 = vadd.f32 %v2831_v11, %v2652_v46  ;;  %v3490_v12 = vpop.f32.mrb[54].mxu0 }
 0x68f   : > { %2705 = vst.msk [vmem:[%s4729_s16 + $0x30] sm:$0xff] %vm389_vm0, %v2661_v45  ;;  %v2664_v19 = vadd.f32 %v3490_v12, %v2831_v11  ;;  %v2655_v38 = vpop.f32.mrb[55].mxu0 }
 0x690   : > { %2703 = vst.msk [vmem:[%s4729_s16 + $0x20] sm:$0xff] %vm389_vm0, %v2653_v27  ;;  %v2656_v5 = vadd.f32 %v2831_v11, %v2655_v38 }
 0x691   : > { %2706 = vst.msk [vmem:[%s4729_s16 + $0x38] sm:$0xff] %vm389_vm0, %v2664_v19 }
 0x692   : > { %2704 = vst.msk [vmem:[%s4729_s16 + $0x28] sm:$0xff] %vm389_vm0, %v2656_v5 }
 0x6ac   : > { %v3493_v33 = vpop.f32.mrb[56].mxu0 }
 0x6ad   : > { %v2677_v26 = vadd.f32 %v3493_v33, %v2831_v11  ;;  %v2668_v6 = vpop.f32.mrb[57].mxu0 }
 0x6ae   : > { %v2669_v36 = vadd.f32 %v2831_v11, %v2668_v6  ;;  %v3494_v43 = vpop.f32.mrb[58].mxu0 }
 0x6af   : > { %2709 = vst.msk [vmem:[%s4729_s16 + $0x50] sm:$0xff] %vm389_vm0, %v2677_v26  ;;  %v2680_v29 = vadd.f32 %v3494_v43, %v2831_v11  ;;  %v2671_v30 = vpop.f32.mrb[59].mxu0 }
 0x6b0   : > { %2707 = vst.msk [vmem:[%s4729_s16 + $0x40] sm:$0xff] %vm389_vm0, %v2669_v36  ;;  %v2672_v4 = vadd.f32 %v2831_v11, %v2671_v30 }
 0x6b1   : > { %2710 = vst.msk [vmem:[%s4729_s16 + $0x58] sm:$0xff] %vm389_vm0, %v2680_v29 }
 0x6b2   : > { %2708 = vst.msk [vmem:[%s4729_s16 + $0x48] sm:$0xff] %vm389_vm0, %v2672_v4 }
 0x6cc   : > { %v3497_v58 = vpop.f32.mrb[60].mxu0 }
 0x6cd   : > { %v2693_v22 = vadd.f32 %v3497_v58, %v2831_v11  ;;  %v2684_v7 = vpop.f32.mrb[61].mxu0 }
 0x6ce   : > { %v2685_v55 = vadd.f32 %v2831_v11, %v2684_v7  ;;  %v3498_v8 = vpop.f32.mrb[62].mxu0 }
 0x6cf   : > { %2713 = vst.msk [vmem:[%s4729_s16 + $0x70] sm:$0xff] %vm389_vm0, %v2693_v22  ;;  %v2696_v13 = vadd.f32 %v3498_v8, %v2831_v11  ;;  %v2687_v51 = vpop.f32.mrb[63].mxu0 }
 0x6d0   : > { %2711 = vst.msk [vmem:[%s4729_s16 + $0x60] sm:$0xff] %vm389_vm0, %v2685_v55  ;;  %v2688_v14 = vadd.f32 %v2831_v11, %v2687_v51 }
 0x6d1   : > { %2714 = vst.msk [vmem:[%s4729_s16 + $0x78] sm:$0xff] %vm389_vm0, %v2696_v13 }
 0x6d2   : > { %2712 = vst.msk [vmem:[%s4729_s16 + $0x68] sm:$0xff] %vm389_vm0, %v2688_v14 }
 0x6d3 PF: > { %s18_s27 = sadd.s32 1, %s3642_s27  }
 0x6d4   : > { %p15_p4 = scmp.ge.s32.totalorder %s18_s27, 6  }
 0x6d6   :  { %17 = sbr.rel (!%p15_p4) target bundleno = 1 (0x1), region = 82 }

</bundles_post_ra>
